<compile_context>
chip_gen: v5e
topology: v5e:2x2
jax: 0.10.0
libtpu: 0.0.40
codegen_flags: <defaults>
</compile_context>

<pallas_src>
import functools
import math

import jax
import jax.numpy as jnp
from jax import lax
from jax.experimental import pallas as pl
from jax.experimental.pallas import tpu as pltpu

PAD_IDX = 0
NEG_INF = -1e9


# ----------------------------------------------------------------------------
# small host-side helpers
# ----------------------------------------------------------------------------
def _vmem_limit_bytes():
    """~75% of physical VMEM, capped at 96 MiB (=> ~48 MiB on v7x, 96 MiB v5e/v6e)."""
    try:
        cap = int(pltpu.get_tpu_info().vmem_capacity_bytes)
    except Exception:
        cap = 64 * 1024 * 1024
    return int(min(cap * 3 // 4, 96 * 1024 * 1024))


def _choose_tile(dim, candidates):
    for c in candidates:
        if dim >= c and dim % c == 0:
            return c
    return dim  # fall back to the whole (untiled) dimension


# ----------------------------------------------------------------------------
# in-kernel helpers (traced inside the Pallas body)
# ----------------------------------------------------------------------------
def _layer_norm(x, gamma, beta, eps=1e-5):
    mu = jnp.mean(x, axis=-1, keepdims=True)
    var = jnp.mean(jnp.square(x - mu), axis=-1, keepdims=True)
    return (x - mu) * lax.rsqrt(var + eps) * gamma + beta


def _mha(head, x_q, x_kv, mask_add, wq, bq, wk, bk, wv, bv, wo, bo):
    """Multi-head attention with merged-lane projections.

    x_q: (tq, E) f32, x_kv: (Skv, E) f32, mask_add broadcastable to (tq, Skv).
    wq/wk: (E, H*d_k) bf16, wv: (E, H*d_v) bf16, wo: (H*d_v, E) bf16, biases f32.
    """
    cdt = wq.dtype
    d_k = wq.shape[1] // head
    d_v = wv.shape[1] // head

    xq_c = x_q.astype(cdt)
    xkv_c = x_kv.astype(cdt)

    # merged projections: one full-lane-width MXU matmul each
    q = jnp.dot(xq_c, wq, preferred_element_type=jnp.float32) + bq    # (tq, H*dk)
    k = jnp.dot(xkv_c, wk, preferred_element_type=jnp.float32) + bk   # (Skv, H*dk)
    v = jnp.dot(xkv_c, wv, preferred_element_type=jnp.float32) + bv   # (Skv, H*dv)

    # fold the 1/sqrt(dk) score scale into q (tq*H*dk work instead of tq*Skv*H)
    q = (q * (1.0 / math.sqrt(d_k))).astype(cdt)
    k = k.astype(cdt)
    v = v.astype(cdt)

    outs = []
    for hh in range(head):
        qh = q[:, hh * d_k:(hh + 1) * d_k]          # (tq, dk)  static lane slice
        kh = k[:, hh * d_k:(hh + 1) * d_k]          # (Skv, dk)
        vh = v[:, hh * d_v:(hh + 1) * d_v]          # (Skv, dv)

        s = jnp.einsum("qk,sk->qs", qh, kh, preferred_element_type=jnp.float32)
        s = s + mask_add
        s = s - jnp.max(s, axis=-1, keepdims=True)
        p = jnp.exp(s)
        p = p * pl.reciprocal(jnp.sum(p, axis=-1, keepdims=True), approx=True)

        outs.append(jnp.dot(p.astype(cdt), vh, preferred_element_type=jnp.float32))

    # merge heads -> ONE output-projection matmul contracting H*dv
    o_cat = jnp.concatenate(outs, axis=-1)                             # (tq, H*dv)
    return jnp.dot(o_cat.astype(cdt), wo, preferred_element_type=jnp.float32) + bo


# ----------------------------------------------------------------------------
# fused decoder-block kernel: self-attn -> add&norm -> cross-attn -> add&norm
#                             -> FFN -> add&norm   (grid over batch x q-tiles)
# ----------------------------------------------------------------------------
def decoder_block_kernel(head,
                         x_ref, enc_ref, sb_ref, cb_ref,
                         wq1, bq1, wk1, bk1, wv1, bv1, wo1, bo1, g1, be1,
                         wq2, bq2, wk2, bk2, wv2, bv2, wo2, bo2, g2, be2,
                         w1, b1, w2, b2, g3, be3,
                         out_ref):
    s_full = x_ref.shape[1]            # full decoder sequence length
    tq = out_ref.shape[1]              # query-tile length
    q0 = pl.multiple_of(pl.program_id(1) * tq, tq)

    x_full = x_ref[0]                               # (S, E)   self-attn KV
    x_q = x_ref[0, pl.ds(q0, tq), :]                # (tq, E)  query tile (same block)
    enc = enc_ref[0]                                # (Senc, E) encoder output
    self_key_bias = sb_ref[0]                       # (1, S)    0 / -1e9 pad bias
    cross_key_bias = cb_ref[0]                      # (1, Senc)

    # causal + pad additive mask built in-kernel (no (B,S,S) mask traffic)
    row = q0 + lax.broadcasted_iota(jnp.int32, (tq, s_full), 0)
    col = lax.broadcasted_iota(jnp.int32, (tq, s_full), 1)
    mask1 = jnp.where(col > row, NEG_INF, 0.0).astype(jnp.float32) + self_key_bias
    mask2 = cross_key_bias                          # (1, Senc), broadcasts over rows

    # masked multi-head self attention + residual + layer norm
    z = _mha(head, x_q, x_full, mask1,
             wq1[...], bq1[...], wk1[...], bk1[...],
             wv1[...], bv1[...], wo1[...], bo1[...])
    x = _layer_norm(x_q + z, g1[...], be1[...])

    # encoder-decoder cross attention + residual + layer norm
    z = _mha(head, x, enc, mask2,
             wq2[...], bq2[...], wk2[...], bk2[...],
             wv2[...], bv2[...], wo2[...], bo2[...])
    x = _layer_norm(x + z, g2[...], be2[...])

    # position-wise feed forward + residual + layer norm
    cdt = w1.dtype
    h = jnp.maximum(
        jnp.dot(x.astype(cdt), w1[...], preferred_element_type=jnp.float32) + b1[...],
        0.0)
    z = jnp.dot(h.astype(cdt), w2[...], preferred_element_type=jnp.float32) + b2[...]
    x = _layer_norm(x + z, g3[...], be3[...])

    out_ref[0] = x.astype(out_ref.dtype)


_BLOCK_WEIGHT_NAMES = (
    "wq1", "bq1", "wk1", "bk1", "wv1", "bv1", "wo1", "bo1", "g1", "be1",
    "wq2", "bq2", "wk2", "bk2", "wv2", "bv2", "wo2", "bo2", "g2", "be2",
    "w1", "b1", "w2", "b2", "g3", "be3",
)


def decoder_block(x, enc_z, self_key_bias, cross_key_bias, bp, head, *, tq_max=256):
    B, S, E = x.shape
    S_enc = enc_z.shape[1]
    tq = S if S <= tq_max else _choose_tile(S, (256, 128))
    n_qt = S // tq

    weights = [bp[name] for name in _BLOCK_WEIGHT_NAMES]

    def w_spec(shape):
        nd = len(shape)
        return pl.BlockSpec(tuple(shape), lambda b, q, _n=nd: (0,) * _n)

    in_specs = [
        pl.BlockSpec((1, S, E), lambda b, q: (b, 0, 0)),         # full seq (self KV + q-tile)
        pl.BlockSpec((1, S_enc, E), lambda b, q: (b, 0, 0)),     # encoder output
        pl.BlockSpec((1, 1, S), lambda b, q: (b, 0, 0)),         # self pad bias
        pl.BlockSpec((1, 1, S_enc), lambda b, q: (b, 0, 0)),     # cross pad bias
    ] + [w_spec(w.shape) for w in weights]
    out_specs = pl.BlockSpec((1, tq, E), lambda b, q: (b, q, 0))

    # advisory cost estimate (MXU flops / exp count / HBM bytes)
    Hdk = bp["wq1"].shape[1]
    Hdv = bp["wv1"].shape[1]
    F = bp["w1"].shape[1]
    flops = 2 * B * (
        S * E * (2 * Hdk + Hdv) + S * S * (Hdk + Hdv) + S * Hdv * E          # self attn
        + S * E * Hdk + S_enc * E * (Hdk + Hdv) + S * S_enc * (Hdk + Hdv)    # cross attn
        + S * Hdv * E
        + 2 * S * E * F)                                                      # FFN
    w_bytes = sum(int(w.size) * w.dtype.itemsize for w in weights)
    cost = pl.CostEstimate(
        flops=int(flops),
        transcendentals=int(B * head * S * (S + S_enc)),
        bytes_accessed=int(8 * B * S * E + 4 * B * S_enc * E
                           + 4 * B * (S + S_enc) + w_bytes))

    kernel = functools.partial(decoder_block_kernel, head)
    return pl.pallas_call(
        kernel,
        out_shape=jax.ShapeDtypeStruct((B, S, E), jnp.float32),
        grid=(B, n_qt),
        in_specs=in_specs,
        out_specs=out_specs,
        compiler_params=pltpu.CompilerParams(
            dimension_semantics=("parallel", "parallel"),
            vmem_limit_bytes=_vmem_limit_bytes()),
        cost_estimate=cost,
    )(x, enc_z, self_key_bias, cross_key_bias, *weights)


# ----------------------------------------------------------------------------
# final vocab projection kernel, tiled over (M, V)
# ----------------------------------------------------------------------------
def linear_kernel(x_ref, w_ref, b_ref, o_ref):
    o_ref[...] = (jnp.dot(x_ref[...].astype(w_ref.dtype), w_ref[...],
                          preferred_element_type=jnp.float32) + b_ref[...])


def final_linear(x2d, w, b):
    M, E = x2d.shape
    V = w.shape[1]
    tm = _choose_tile(M, (256, 128))
    tv = _choose_tile(V, (2048, 1024, 512, 256, 128))
    cost = pl.CostEstimate(
        flops=2 * M * E * V,
        transcendentals=0,
        bytes_accessed=4 * M * E + int(w.dtype.itemsize) * E * V + 4 * V + 4 * M * V)
    return pl.pallas_call(
        linear_kernel,
        out_shape=jax.ShapeDtypeStruct((M, V), jnp.float32),
        grid=(M // tm, V // tv),
        in_specs=[pl.BlockSpec((tm, E), lambda i, j: (i, 0)),
                  pl.BlockSpec((E, tv), lambda i, j: (0, j)),
                  pl.BlockSpec((1, tv), lambda i, j: (0, j))],
        out_specs=pl.BlockSpec((tm, tv), lambda i, j: (i, j)),
        compiler_params=pltpu.CompilerParams(
            dimension_semantics=("parallel", "parallel"),
            vmem_limit_bytes=_vmem_limit_bytes()),
        cost_estimate=cost,
    )(x2d, w, b)


# ----------------------------------------------------------------------------
# glue: embedding + sinusoidal positional encoding, pad biases, param init
# ----------------------------------------------------------------------------
def sinusoidal_pos_encoding(seq_max_len, e):
    pos = jnp.arange(seq_max_len, dtype=jnp.float32)[:, None]
    div = jnp.exp(-jnp.arange(0, e, 2, dtype=jnp.float32) * (math.log(10000.0) / e))
    ang = pos * div
    pe = jnp.zeros((seq_max_len, e), jnp.float32)
    pe = pe.at[:, 0::2].set(jnp.sin(ang))
    pe = pe.at[:, 1::2].set(jnp.cos(ang))
    return pe


def init_params(key, vocab, e, d_k, d_v, f, nblocks, head, seq_max_len=5000):
    n_rand = 1 + nblocks * 20 + 2
    keys = iter(jax.random.split(key, n_rand))

    def lin(shape):
        # matmul weights stored bf16 (MXU operand dtype); accumulation stays f32
        return (jax.random.normal(next(keys), shape, jnp.float32) * 0.02
                ).astype(jnp.bfloat16)

    def bias(shape):
        return jax.random.normal(next(keys), shape, jnp.float32) * 0.02

    params = {"emb": jax.random.normal(next(keys), (vocab, e), jnp.float32) * 0.02,
              "pos": sinusoidal_pos_encoding(seq_max_len, e),
              "head": head,
              "blocks": []}
    for _ in range(nblocks):
        bp = {
            # merged-lane projection weights: (E, H*dk) / (E, H*dv)
            "wq1": lin((e, head * d_k)), "bq1": bias((1, head * d_k)),
            "wk1": lin((e, head * d_k)), "bk1": bias((1, head * d_k)),
            "wv1": lin((e, head * d_v)), "bv1": bias((1, head * d_v)),
            "wo1": lin((head * d_v, e)), "bo1": bias((1, e)),
            "g1": jnp.ones((1, e), jnp.float32), "be1": jnp.zeros((1, e), jnp.float32),
            "wq2": lin((e, head * d_k)), "bq2": bias((1, head * d_k)),
            "wk2": lin((e, head * d_k)), "bk2": bias((1, head * d_k)),
            "wv2": lin((e, head * d_v)), "bv2": bias((1, head * d_v)),
            "wo2": lin((head * d_v, e)), "bo2": bias((1, e)),
            "g2": jnp.ones((1, e), jnp.float32), "be2": jnp.zeros((1, e), jnp.float32),
            "w1": lin((e, f)), "b1": bias((1, f)),
            "w2": lin((f, e)), "b2": bias((1, e)),
            "g3": jnp.ones((1, e), jnp.float32), "be3": jnp.zeros((1, e), jnp.float32),
        }
        params["blocks"].append(bp)
    params["out_w"] = lin((e, vocab))
    params["out_b"] = bias((1, vocab))
    return params


def decoder_forward(params, x_tok, encoder_z, encoder_x, *, head=None, d_k=None, d_v=None):
    del d_k, d_v                 # sizes are carried by the weight shapes
    head = params.get("head", head)
    B, S = x_tok.shape
    E = encoder_z.shape[-1]
    V = params["out_w"].shape[1]

    # per-key pad biases (O(B*S)); the causal part of the mask is built in-kernel
    self_key_bias = jnp.where(x_tok == PAD_IDX, NEG_INF, 0.0
                              ).astype(jnp.float32)[:, None, :]      # (B,1,S)
    cross_key_bias = jnp.where(encoder_x == PAD_IDX, NEG_INF, 0.0
                               ).astype(jnp.float32)[:, None, :]     # (B,1,S_enc)

    # EmbeddingwithPosition (glue); dropout is identity in eval mode
    # TODO(synk): nn.Dropout(p=0.1) omitted (inference semantics; identity).
    x = jnp.take(params["emb"], x_tok, axis=0) + params["pos"][None, :S, :]
    x = x.astype(jnp.float32)

    # NOTE: no input_output_aliases between blocks -- each kernel re-reads the
    # full sequence as self-attention KV while writing per-(batch, q-tile)
    # output blocks, so aliasing the activation buffer would be unsafe once the
    # sequence is query-tiled.
    for bp in params["blocks"]:
        x = decoder_block(x, encoder_z, self_key_bias, cross_key_bias, bp, head)

    logits = final_linear(x.reshape(B * S, E), params["out_w"], params["out_b"])
    return logits.reshape(B, S, V)


# ----------------------------------------------------------------------------
if __name__ == "__main__":
    # small but lane-dense sizes (E, head*d_k, head*d_v, F, V multiples of 128)
    B, S, S_ENC = 2, 8, 8
    VOCAB, EMB, QK, DV, FSZ, NBLOCKS, HEAD = 512, 128, 32, 32, 256, 2, 4

    key = jax.random.PRNGKey(0)
    kp, kx, kex, kez = jax.random.split(key, 4)

    params = init_params(kp, VOCAB, EMB, QK, DV, FSZ, NBLOCKS, HEAD)

    x_tok = jax.random.randint(kx, (B, S), 1, VOCAB, dtype=jnp.int32)
    x_tok = x_tok.at[:, -2:].set(PAD_IDX)            # some decoder padding
    enc_tok = jax.random.randint(kex, (B, S_ENC), 1, VOCAB, dtype=jnp.int32)
    enc_tok = enc_tok.at[:, -1:].set(PAD_IDX)        # some encoder padding
    enc_z = jax.random.normal(kez, (B, S_ENC, EMB), jnp.float32)

    out = decoder_forward(params, x_tok, enc_z, enc_tok,
                          head=HEAD, d_k=QK, d_v=DV)
    jax.block_until_ready(out)
    assert out.shape == (B, S, VOCAB) and out.dtype == jnp.float32
    assert bool(jnp.all(jnp.isfinite(out)))
    print("KERNEL_OK")
</pallas_src>

<mosaic_0001>
module attributes {stable_mosaic.version = 11 : i64} {
  func.func @decoder_block_kernel(%arg0: i32, %arg1: i32, %arg2: memref<1x8x128xf32, #tpu.memory_space<vmem>>, %arg3: memref<1x8x128xf32, #tpu.memory_space<vmem>>, %arg4: memref<1x1x8xf32, #tpu.memory_space<vmem>>, %arg5: memref<1x1x8xf32, #tpu.memory_space<vmem>>, %arg6: memref<128x128xbf16, #tpu.memory_space<vmem>>, %arg7: memref<1x128xf32, #tpu.memory_space<vmem>>, %arg8: memref<128x128xbf16, #tpu.memory_space<vmem>>, %arg9: memref<1x128xf32, #tpu.memory_space<vmem>>, %arg10: memref<128x128xbf16, #tpu.memory_space<vmem>>, %arg11: memref<1x128xf32, #tpu.memory_space<vmem>>, %arg12: memref<128x128xbf16, #tpu.memory_space<vmem>>, %arg13: memref<1x128xf32, #tpu.memory_space<vmem>>, %arg14: memref<1x128xf32, #tpu.memory_space<vmem>>, %arg15: memref<1x128xf32, #tpu.memory_space<vmem>>, %arg16: memref<128x128xbf16, #tpu.memory_space<vmem>>, %arg17: memref<1x128xf32, #tpu.memory_space<vmem>>, %arg18: memref<128x128xbf16, #tpu.memory_space<vmem>>, %arg19: memref<1x128xf32, #tpu.memory_space<vmem>>, %arg20: memref<128x128xbf16, #tpu.memory_space<vmem>>, %arg21: memref<1x128xf32, #tpu.memory_space<vmem>>, %arg22: memref<128x128xbf16, #tpu.memory_space<vmem>>, %arg23: memref<1x128xf32, #tpu.memory_space<vmem>>, %arg24: memref<1x128xf32, #tpu.memory_space<vmem>>, %arg25: memref<1x128xf32, #tpu.memory_space<vmem>>, %arg26: memref<128x256xbf16, #tpu.memory_space<vmem>>, %arg27: memref<1x256xf32, #tpu.memory_space<vmem>>, %arg28: memref<256x128xbf16, #tpu.memory_space<vmem>>, %arg29: memref<1x128xf32, #tpu.memory_space<vmem>>, %arg30: memref<1x128xf32, #tpu.memory_space<vmem>>, %arg31: memref<1x128xf32, #tpu.memory_space<vmem>>, %arg32: memref<1x8x128xf32, #tpu.memory_space<vmem>>) attributes {dimension_semantics = [#tpu.dimension_semantics<parallel>, #tpu.dimension_semantics<parallel>], iteration_bounds = array<i64: 2, 1>, scalar_prefetch = 0 : i64, scratch_operands = 0 : i64, tpu.core_type = #tpu.core_type<tc>, window_params = [{transform_indices = @transform_0, window_bounds = array<i64: 1, 8, 128>}, {transform_indices = @transform_1, window_bounds = array<i64: 1, 8, 128>}, {transform_indices = @transform_2, window_bounds = array<i64: 1, 1, 8>}, {transform_indices = @transform_3, window_bounds = array<i64: 1, 1, 8>}, {pipeline_mode = #tpu.pipeline_mode<synchronous>, transform_indices = @transform_4, window_bounds = array<i64: 128, 128>}, {pipeline_mode = #tpu.pipeline_mode<synchronous>, transform_indices = @transform_5, window_bounds = array<i64: 1, 128>}, {pipeline_mode = #tpu.pipeline_mode<synchronous>, transform_indices = @transform_6, window_bounds = array<i64: 128, 128>}, {pipeline_mode = #tpu.pipeline_mode<synchronous>, transform_indices = @transform_7, window_bounds = array<i64: 1, 128>}, {pipeline_mode = #tpu.pipeline_mode<synchronous>, transform_indices = @transform_8, window_bounds = array<i64: 128, 128>}, {pipeline_mode = #tpu.pipeline_mode<synchronous>, transform_indices = @transform_9, window_bounds = array<i64: 1, 128>}, {pipeline_mode = #tpu.pipeline_mode<synchronous>, transform_indices = @transform_10, window_bounds = array<i64: 128, 128>}, {pipeline_mode = #tpu.pipeline_mode<synchronous>, transform_indices = @transform_11, window_bounds = array<i64: 1, 128>}, {pipeline_mode = #tpu.pipeline_mode<synchronous>, transform_indices = @transform_12, window_bounds = array<i64: 1, 128>}, {pipeline_mode = #tpu.pipeline_mode<synchronous>, transform_indices = @transform_13, window_bounds = array<i64: 1, 128>}, {pipeline_mode = #tpu.pipeline_mode<synchronous>, transform_indices = @transform_14, window_bounds = array<i64: 128, 128>}, {pipeline_mode = #tpu.pipeline_mode<synchronous>, transform_indices = @transform_15, window_bounds = array<i64: 1, 128>}, {pipeline_mode = #tpu.pipeline_mode<synchronous>, transform_indices = @transform_16, window_bounds = array<i64: 128, 128>}, {pipeline_mode = #tpu.pipeline_mode<synchronous>, transform_indices = @transform_17, window_bounds = array<i64: 1, 128>}, {pipeline_mode = #tpu.pipeline_mode<synchronous>, transform_indices = @transform_18, window_bounds = array<i64: 128, 128>}, {pipeline_mode = #tpu.pipeline_mode<synchronous>, transform_indices = @transform_19, window_bounds = array<i64: 1, 128>}, {pipeline_mode = #tpu.pipeline_mode<synchronous>, transform_indices = @transform_20, window_bounds = array<i64: 128, 128>}, {pipeline_mode = #tpu.pipeline_mode<synchronous>, transform_indices = @transform_21, window_bounds = array<i64: 1, 128>}, {pipeline_mode = #tpu.pipeline_mode<synchronous>, transform_indices = @transform_22, window_bounds = array<i64: 1, 128>}, {pipeline_mode = #tpu.pipeline_mode<synchronous>, transform_indices = @transform_23, window_bounds = array<i64: 1, 128>}, {pipeline_mode = #tpu.pipeline_mode<synchronous>, transform_indices = @transform_24, window_bounds = array<i64: 128, 256>}, {pipeline_mode = #tpu.pipeline_mode<synchronous>, transform_indices = @transform_25, window_bounds = array<i64: 1, 256>}, {pipeline_mode = #tpu.pipeline_mode<synchronous>, transform_indices = @transform_26, window_bounds = array<i64: 256, 128>}, {pipeline_mode = #tpu.pipeline_mode<synchronous>, transform_indices = @transform_27, window_bounds = array<i64: 1, 128>}, {pipeline_mode = #tpu.pipeline_mode<synchronous>, transform_indices = @transform_28, window_bounds = array<i64: 1, 128>}, {pipeline_mode = #tpu.pipeline_mode<synchronous>, transform_indices = @transform_29, window_bounds = array<i64: 1, 128>}, {transform_indices = @transform_30, window_bounds = array<i64: 1, 8, 128>}]} {
    %c8_i32 = arith.constant 8 : i32
    %0 = arith.muli %arg1, %c8_i32 : i32
    %1 = tpu.assume_multiple %0, 8 : i32
    %c0 = arith.constant 0 : index
    %c0_0 = arith.constant 0 : index
    %c0_1 = arith.constant 0 : index
    %2 = vector.load %arg2[%c0, %c0_0, %c0_1] : memref<1x8x128xf32, #tpu.memory_space<vmem>>, vector<1x8x128xf32>
    %3 = vector.shape_cast %2 : vector<1x8x128xf32> to vector<8x128xf32>
    %c0_2 = arith.constant 0 : index
    %4 = arith.index_cast %1 : i32 to index
    %c0_3 = arith.constant 0 : index
    %5 = vector.load %arg2[%c0_2, %4, %c0_3] : memref<1x8x128xf32, #tpu.memory_space<vmem>>, vector<1x8x128xf32>
    %6 = vector.shape_cast %5 : vector<1x8x128xf32> to vector<8x128xf32>
    %c0_4 = arith.constant 0 : index
    %c0_5 = arith.constant 0 : index
    %c0_6 = arith.constant 0 : index
    %7 = vector.load %arg3[%c0_4, %c0_5, %c0_6] : memref<1x8x128xf32, #tpu.memory_space<vmem>>, vector<1x8x128xf32>
    %8 = vector.shape_cast %7 : vector<1x8x128xf32> to vector<8x128xf32>
    %c0_7 = arith.constant 0 : index
    %c0_8 = arith.constant 0 : index
    %c0_9 = arith.constant 0 : index
    %9 = vector.load %arg4[%c0_7, %c0_8, %c0_9] : memref<1x1x8xf32, #tpu.memory_space<vmem>>, vector<1x1x8xf32>
    %10 = vector.shape_cast %9 : vector<1x1x8xf32> to vector<1x8xf32>
    %c0_10 = arith.constant 0 : index
    %c0_11 = arith.constant 0 : index
    %c0_12 = arith.constant 0 : index
    %11 = vector.load %arg5[%c0_10, %c0_11, %c0_12] : memref<1x1x8xf32, #tpu.memory_space<vmem>>, vector<1x1x8xf32>
    %12 = vector.shape_cast %11 : vector<1x1x8xf32> to vector<1x8xf32>
    %13 = tpu.iota {dimensions = array<i32: 0>} : vector<8x8xi32>
    %14 = vector.broadcast %1 : i32 to vector<8x8xi32>
    %15 = arith.addi %14, %13 : vector<8x8xi32>
    %16 = tpu.iota {dimensions = array<i32: 1>} : vector<8x8xi32>
    %17 = arith.cmpi sgt, %16, %15 : vector<8x8xi32>
    %cst = arith.constant -1.000000e+09 : f32
    %cst_13 = arith.constant 0.000000e+00 : f32
    %18 = vector.broadcast %cst : f32 to vector<8x8xf32>
    %19 = vector.broadcast %cst_13 : f32 to vector<8x8xf32>
    %20 = arith.select %17, %18, %19 : vector<8x8xi1>, vector<8x8xf32>
    %21 = vector.broadcast %10 : vector<1x8xf32> to vector<8x8xf32>
    %22 = arith.addf %20, %21 : vector<8x8xf32>
    %c0_14 = arith.constant 0 : index
    %c0_15 = arith.constant 0 : index
    %23 = vector.load %arg6[%c0_14, %c0_15] : memref<128x128xbf16, #tpu.memory_space<vmem>>, vector<128x128xbf16>
    %c0_16 = arith.constant 0 : index
    %c0_17 = arith.constant 0 : index
    %24 = vector.load %arg7[%c0_16, %c0_17] : memref<1x128xf32, #tpu.memory_space<vmem>>, vector<1x128xf32>
    %c0_18 = arith.constant 0 : index
    %c0_19 = arith.constant 0 : index
    %25 = vector.load %arg8[%c0_18, %c0_19] : memref<128x128xbf16, #tpu.memory_space<vmem>>, vector<128x128xbf16>
    %c0_20 = arith.constant 0 : index
    %c0_21 = arith.constant 0 : index
    %26 = vector.load %arg9[%c0_20, %c0_21] : memref<1x128xf32, #tpu.memory_space<vmem>>, vector<1x128xf32>
    %c0_22 = arith.constant 0 : index
    %c0_23 = arith.constant 0 : index
    %27 = vector.load %arg10[%c0_22, %c0_23] : memref<128x128xbf16, #tpu.memory_space<vmem>>, vector<128x128xbf16>
    %c0_24 = arith.constant 0 : index
    %c0_25 = arith.constant 0 : index
    %28 = vector.load %arg11[%c0_24, %c0_25] : memref<1x128xf32, #tpu.memory_space<vmem>>, vector<1x128xf32>
    %c0_26 = arith.constant 0 : index
    %c0_27 = arith.constant 0 : index
    %29 = vector.load %arg12[%c0_26, %c0_27] : memref<128x128xbf16, #tpu.memory_space<vmem>>, vector<128x128xbf16>
    %c0_28 = arith.constant 0 : index
    %c0_29 = arith.constant 0 : index
    %30 = vector.load %arg13[%c0_28, %c0_29] : memref<1x128xf32, #tpu.memory_space<vmem>>, vector<1x128xf32>
    %31 = arith.truncf %6 : vector<8x128xf32> to vector<8x128xbf16>
    %32 = arith.truncf %3 : vector<8x128xf32> to vector<8x128xbf16>
    %cst_30 = arith.constant dense<0.000000e+00> : vector<8x128xf32>
    %33 = tpu.matmul %31, %23, %cst_30 {dimension_numbers = #tpu.dot_dimension_numbers<[1], [0], [0], [1], [0, 0, 1, 1], [], []>} : vector<8x128xbf16>, vector<128x128xbf16>, vector<8x128xf32> -> vector<8x128xf32>
    %34 = vector.broadcast %24 : vector<1x128xf32> to vector<8x128xf32>
    %35 = arith.addf %33, %34 : vector<8x128xf32>
    %cst_31 = arith.constant dense<0.000000e+00> : vector<8x128xf32>
    %36 = tpu.matmul %32, %25, %cst_31 {dimension_numbers = #tpu.dot_dimension_numbers<[1], [0], [0], [1], [0, 0, 1, 1], [], []>} : vector<8x128xbf16>, vector<128x128xbf16>, vector<8x128xf32> -> vector<8x128xf32>
    %37 = vector.broadcast %26 : vector<1x128xf32> to vector<8x128xf32>
    %38 = arith.addf %36, %37 : vector<8x128xf32>
    %cst_32 = arith.constant dense<0.000000e+00> : vector<8x128xf32>
    %39 = tpu.matmul %32, %27, %cst_32 {dimension_numbers = #tpu.dot_dimension_numbers<[1], [0], [0], [1], [0, 0, 1, 1], [], []>} : vector<8x128xbf16>, vector<128x128xbf16>, vector<8x128xf32> -> vector<8x128xf32>
    %40 = vector.broadcast %28 : vector<1x128xf32> to vector<8x128xf32>
    %41 = arith.addf %39, %40 : vector<8x128xf32>
    %cst_33 = arith.constant 0.176776692 : f32
    %42 = vector.broadcast %cst_33 : f32 to vector<8x128xf32>
    %43 = arith.mulf %35, %42 : vector<8x128xf32>
    %44 = arith.truncf %43 : vector<8x128xf32> to vector<8x128xbf16>
    %45 = arith.truncf %38 : vector<8x128xf32> to vector<8x128xbf16>
    %46 = arith.truncf %41 : vector<8x128xf32> to vector<8x128xbf16>
    %47 = vector.extract_strided_slice %44 {offsets = [0, 0], sizes = [8, 32], strides = [1, 1]} : vector<8x128xbf16> to vector<8x32xbf16>
    %48 = vector.extract_strided_slice %45 {offsets = [0, 0], sizes = [8, 32], strides = [1, 1]} : vector<8x128xbf16> to vector<8x32xbf16>
    %49 = vector.extract_strided_slice %46 {offsets = [0, 0], sizes = [8, 32], strides = [1, 1]} : vector<8x128xbf16> to vector<8x32xbf16>
    "tpu.trace_start"() <{level = 10 : i32, message = "qk,sk->qs"}> : () -> ()
    %cst_34 = arith.constant dense<0.000000e+00> : vector<8x8xf32>
    %50 = tpu.matmul %47, %48, %cst_34 {dimension_numbers = #tpu.dot_dimension_numbers<[1], [1], [0], [0], [0, 0, 1, 0], [], []>} : vector<8x32xbf16>, vector<8x32xbf16>, vector<8x8xf32> -> vector<8x8xf32>
    "tpu.trace_stop"() : () -> ()
    %51 = arith.addf %50, %22 : vector<8x8xf32>
    %cst_35 = arith.constant dense<0xFF800000> : vector<8xf32>
    %52 = vector.multi_reduction <maximumf>, %51, %cst_35 [1] : vector<8x8xf32> to vector<8xf32>
    %53 = vector.shape_cast %52 : vector<8xf32> to vector<8x1xf32>
    %54 = vector.broadcast %53 : vector<8x1xf32> to vector<8x8xf32>
    %55 = arith.subf %51, %54 : vector<8x8xf32>
    %56 = math.exp %55 : vector<8x8xf32>
    %cst_36 = arith.constant dense<0.000000e+00> : vector<8xf32>
    %57 = vector.multi_reduction <add>, %56, %cst_36 [1] : vector<8x8xf32> to vector<8xf32>
    %58 = vector.shape_cast %57 : vector<8xf32> to vector<8x1xf32>
    %59 = tpu.reciprocal %58 {approx = true} : vector<8x1xf32> -> vector<8x1xf32>
    %60 = vector.broadcast %59 : vector<8x1xf32> to vector<8x8xf32>
    %61 = arith.mulf %56, %60 : vector<8x8xf32>
    %62 = arith.truncf %61 : vector<8x8xf32> to vector<8x8xbf16>
    %cst_37 = arith.constant dense<0.000000e+00> : vector<8x32xf32>
    %63 = tpu.matmul %62, %49, %cst_37 {dimension_numbers = #tpu.dot_dimension_numbers<[1], [0], [0], [1], [0, 0, 1, 1], [], []>} : vector<8x8xbf16>, vector<8x32xbf16>, vector<8x32xf32> -> vector<8x32xf32>
    %64 = vector.extract_strided_slice %44 {offsets = [0, 32], sizes = [8, 32], strides = [1, 1]} : vector<8x128xbf16> to vector<8x32xbf16>
    %65 = vector.extract_strided_slice %45 {offsets = [0, 32], sizes = [8, 32], strides = [1, 1]} : vector<8x128xbf16> to vector<8x32xbf16>
    %66 = vector.extract_strided_slice %46 {offsets = [0, 32], sizes = [8, 32], strides = [1, 1]} : vector<8x128xbf16> to vector<8x32xbf16>
    "tpu.trace_start"() <{level = 10 : i32, message = "qk,sk->qs"}> : () -> ()
    %cst_38 = arith.constant dense<0.000000e+00> : vector<8x8xf32>
    %67 = tpu.matmul %64, %65, %cst_38 {dimension_numbers = #tpu.dot_dimension_numbers<[1], [1], [0], [0], [0, 0, 1, 0], [], []>} : vector<8x32xbf16>, vector<8x32xbf16>, vector<8x8xf32> -> vector<8x8xf32>
    "tpu.trace_stop"() : () -> ()
    %68 = arith.addf %67, %22 : vector<8x8xf32>
    %cst_39 = arith.constant dense<0xFF800000> : vector<8xf32>
    %69 = vector.multi_reduction <maximumf>, %68, %cst_39 [1] : vector<8x8xf32> to vector<8xf32>
    %70 = vector.shape_cast %69 : vector<8xf32> to vector<8x1xf32>
    %71 = vector.broadcast %70 : vector<8x1xf32> to vector<8x8xf32>
    %72 = arith.subf %68, %71 : vector<8x8xf32>
    %73 = math.exp %72 : vector<8x8xf32>
    %cst_40 = arith.constant dense<0.000000e+00> : vector<8xf32>
    %74 = vector.multi_reduction <add>, %73, %cst_40 [1] : vector<8x8xf32> to vector<8xf32>
    %75 = vector.shape_cast %74 : vector<8xf32> to vector<8x1xf32>
    %76 = tpu.reciprocal %75 {approx = true} : vector<8x1xf32> -> vector<8x1xf32>
    %77 = vector.broadcast %76 : vector<8x1xf32> to vector<8x8xf32>
    %78 = arith.mulf %73, %77 : vector<8x8xf32>
    %79 = arith.truncf %78 : vector<8x8xf32> to vector<8x8xbf16>
    %cst_41 = arith.constant dense<0.000000e+00> : vector<8x32xf32>
    %80 = tpu.matmul %79, %66, %cst_41 {dimension_numbers = #tpu.dot_dimension_numbers<[1], [0], [0], [1], [0, 0, 1, 1], [], []>} : vector<8x8xbf16>, vector<8x32xbf16>, vector<8x32xf32> -> vector<8x32xf32>
    %81 = vector.extract_strided_slice %44 {offsets = [0, 64], sizes = [8, 32], strides = [1, 1]} : vector<8x128xbf16> to vector<8x32xbf16>
    %82 = vector.extract_strided_slice %45 {offsets = [0, 64], sizes = [8, 32], strides = [1, 1]} : vector<8x128xbf16> to vector<8x32xbf16>
    %83 = vector.extract_strided_slice %46 {offsets = [0, 64], sizes = [8, 32], strides = [1, 1]} : vector<8x128xbf16> to vector<8x32xbf16>
    "tpu.trace_start"() <{level = 10 : i32, message = "qk,sk->qs"}> : () -> ()
    %cst_42 = arith.constant dense<0.000000e+00> : vector<8x8xf32>
    %84 = tpu.matmul %81, %82, %cst_42 {dimension_numbers = #tpu.dot_dimension_numbers<[1], [1], [0], [0], [0, 0, 1, 0], [], []>} : vector<8x32xbf16>, vector<8x32xbf16>, vector<8x8xf32> -> vector<8x8xf32>
    "tpu.trace_stop"() : () -> ()
    %85 = arith.addf %84, %22 : vector<8x8xf32>
    %cst_43 = arith.constant dense<0xFF800000> : vector<8xf32>
    %86 = vector.multi_reduction <maximumf>, %85, %cst_43 [1] : vector<8x8xf32> to vector<8xf32>
    %87 = vector.shape_cast %86 : vector<8xf32> to vector<8x1xf32>
    %88 = vector.broadcast %87 : vector<8x1xf32> to vector<8x8xf32>
    %89 = arith.subf %85, %88 : vector<8x8xf32>
    %90 = math.exp %89 : vector<8x8xf32>
    %cst_44 = arith.constant dense<0.000000e+00> : vector<8xf32>
    %91 = vector.multi_reduction <add>, %90, %cst_44 [1] : vector<8x8xf32> to vector<8xf32>
    %92 = vector.shape_cast %91 : vector<8xf32> to vector<8x1xf32>
    %93 = tpu.reciprocal %92 {approx = true} : vector<8x1xf32> -> vector<8x1xf32>
    %94 = vector.broadcast %93 : vector<8x1xf32> to vector<8x8xf32>
    %95 = arith.mulf %90, %94 : vector<8x8xf32>
    %96 = arith.truncf %95 : vector<8x8xf32> to vector<8x8xbf16>
    %cst_45 = arith.constant dense<0.000000e+00> : vector<8x32xf32>
    %97 = tpu.matmul %96, %83, %cst_45 {dimension_numbers = #tpu.dot_dimension_numbers<[1], [0], [0], [1], [0, 0, 1, 1], [], []>} : vector<8x8xbf16>, vector<8x32xbf16>, vector<8x32xf32> -> vector<8x32xf32>
    %98 = vector.extract_strided_slice %44 {offsets = [0, 96], sizes = [8, 32], strides = [1, 1]} : vector<8x128xbf16> to vector<8x32xbf16>
    %99 = vector.extract_strided_slice %45 {offsets = [0, 96], sizes = [8, 32], strides = [1, 1]} : vector<8x128xbf16> to vector<8x32xbf16>
    %100 = vector.extract_strided_slice %46 {offsets = [0, 96], sizes = [8, 32], strides = [1, 1]} : vector<8x128xbf16> to vector<8x32xbf16>
    "tpu.trace_start"() <{level = 10 : i32, message = "qk,sk->qs"}> : () -> ()
    %cst_46 = arith.constant dense<0.000000e+00> : vector<8x8xf32>
    %101 = tpu.matmul %98, %99, %cst_46 {dimension_numbers = #tpu.dot_dimension_numbers<[1], [1], [0], [0], [0, 0, 1, 0], [], []>} : vector<8x32xbf16>, vector<8x32xbf16>, vector<8x8xf32> -> vector<8x8xf32>
    "tpu.trace_stop"() : () -> ()
    %102 = arith.addf %101, %22 : vector<8x8xf32>
    %cst_47 = arith.constant dense<0xFF800000> : vector<8xf32>
    %103 = vector.multi_reduction <maximumf>, %102, %cst_47 [1] : vector<8x8xf32> to vector<8xf32>
    %104 = vector.shape_cast %103 : vector<8xf32> to vector<8x1xf32>
    %105 = vector.broadcast %104 : vector<8x1xf32> to vector<8x8xf32>
    %106 = arith.subf %102, %105 : vector<8x8xf32>
    %107 = math.exp %106 : vector<8x8xf32>
    %cst_48 = arith.constant dense<0.000000e+00> : vector<8xf32>
    %108 = vector.multi_reduction <add>, %107, %cst_48 [1] : vector<8x8xf32> to vector<8xf32>
    %109 = vector.shape_cast %108 : vector<8xf32> to vector<8x1xf32>
    %110 = tpu.reciprocal %109 {approx = true} : vector<8x1xf32> -> vector<8x1xf32>
    %111 = vector.broadcast %110 : vector<8x1xf32> to vector<8x8xf32>
    %112 = arith.mulf %107, %111 : vector<8x8xf32>
    %113 = arith.truncf %112 : vector<8x8xf32> to vector<8x8xbf16>
    %cst_49 = arith.constant dense<0.000000e+00> : vector<8x32xf32>
    %114 = tpu.matmul %113, %100, %cst_49 {dimension_numbers = #tpu.dot_dimension_numbers<[1], [0], [0], [1], [0, 0, 1, 1], [], []>} : vector<8x8xbf16>, vector<8x32xbf16>, vector<8x32xf32> -> vector<8x32xf32>
    %115 = tpu.concatenate %63, %80, %97, %114 in 1 : vector<8x32xf32>, vector<8x32xf32>, vector<8x32xf32>, vector<8x32xf32> -> vector<8x128xf32>
    %116 = arith.truncf %115 : vector<8x128xf32> to vector<8x128xbf16>
    %cst_50 = arith.constant dense<0.000000e+00> : vector<8x128xf32>
    %117 = tpu.matmul %116, %29, %cst_50 {dimension_numbers = #tpu.dot_dimension_numbers<[1], [0], [0], [1], [0, 0, 1, 1], [], []>} : vector<8x128xbf16>, vector<128x128xbf16>, vector<8x128xf32> -> vector<8x128xf32>
    %118 = vector.broadcast %30 : vector<1x128xf32> to vector<8x128xf32>
    %119 = arith.addf %117, %118 : vector<8x128xf32>
    %120 = arith.addf %6, %119 : vector<8x128xf32>
    %c0_51 = arith.constant 0 : index
    %c0_52 = arith.constant 0 : index
    %121 = vector.load %arg14[%c0_51, %c0_52] : memref<1x128xf32, #tpu.memory_space<vmem>>, vector<1x128xf32>
    %c0_53 = arith.constant 0 : index
    %c0_54 = arith.constant 0 : index
    %122 = vector.load %arg15[%c0_53, %c0_54] : memref<1x128xf32, #tpu.memory_space<vmem>>, vector<1x128xf32>
    %cst_55 = arith.constant dense<0.000000e+00> : vector<8xf32>
    %123 = vector.multi_reduction <add>, %120, %cst_55 [1] : vector<8x128xf32> to vector<8xf32>
    %124 = vector.shape_cast %123 : vector<8xf32> to vector<8x1xf32>
    %cst_56 = arith.constant 1.280000e+02 : f32
    %125 = vector.broadcast %cst_56 : f32 to vector<8x1xf32>
    %126 = arith.divf %124, %125 : vector<8x1xf32>
    %127 = vector.broadcast %126 : vector<8x1xf32> to vector<8x128xf32>
    %128 = arith.subf %120, %127 : vector<8x128xf32>
    %129 = arith.mulf %128, %128 : vector<8x128xf32>
    %cst_57 = arith.constant dense<0.000000e+00> : vector<8xf32>
    %130 = vector.multi_reduction <add>, %129, %cst_57 [1] : vector<8x128xf32> to vector<8xf32>
    %131 = vector.shape_cast %130 : vector<8xf32> to vector<8x1xf32>
    %cst_58 = arith.constant 1.280000e+02 : f32
    %132 = vector.broadcast %cst_58 : f32 to vector<8x1xf32>
    %133 = arith.divf %131, %132 : vector<8x1xf32>
    %134 = vector.broadcast %126 : vector<8x1xf32> to vector<8x128xf32>
    %135 = arith.subf %120, %134 : vector<8x128xf32>
    %cst_59 = arith.constant 9.99999974E-6 : f32
    %136 = vector.broadcast %cst_59 : f32 to vector<8x1xf32>
    %137 = arith.addf %133, %136 : vector<8x1xf32>
    %138 = math.rsqrt %137 : vector<8x1xf32>
    %139 = vector.broadcast %138 : vector<8x1xf32> to vector<8x128xf32>
    %140 = arith.mulf %135, %139 : vector<8x128xf32>
    %141 = vector.broadcast %121 : vector<1x128xf32> to vector<8x128xf32>
    %142 = arith.mulf %140, %141 : vector<8x128xf32>
    %143 = vector.broadcast %122 : vector<1x128xf32> to vector<8x128xf32>
    %144 = arith.addf %142, %143 : vector<8x128xf32>
    %c0_60 = arith.constant 0 : index
    %c0_61 = arith.constant 0 : index
    %145 = vector.load %arg16[%c0_60, %c0_61] : memref<128x128xbf16, #tpu.memory_space<vmem>>, vector<128x128xbf16>
    %c0_62 = arith.constant 0 : index
    %c0_63 = arith.constant 0 : index
    %146 = vector.load %arg17[%c0_62, %c0_63] : memref<1x128xf32, #tpu.memory_space<vmem>>, vector<1x128xf32>
    %c0_64 = arith.constant 0 : index
    %c0_65 = arith.constant 0 : index
    %147 = vector.load %arg18[%c0_64, %c0_65] : memref<128x128xbf16, #tpu.memory_space<vmem>>, vector<128x128xbf16>
    %c0_66 = arith.constant 0 : index
    %c0_67 = arith.constant 0 : index
    %148 = vector.load %arg19[%c0_66, %c0_67] : memref<1x128xf32, #tpu.memory_space<vmem>>, vector<1x128xf32>
    %c0_68 = arith.constant 0 : index
    %c0_69 = arith.constant 0 : index
    %149 = vector.load %arg20[%c0_68, %c0_69] : memref<128x128xbf16, #tpu.memory_space<vmem>>, vector<128x128xbf16>
    %c0_70 = arith.constant 0 : index
    %c0_71 = arith.constant 0 : index
    %150 = vector.load %arg21[%c0_70, %c0_71] : memref<1x128xf32, #tpu.memory_space<vmem>>, vector<1x128xf32>
    %c0_72 = arith.constant 0 : index
    %c0_73 = arith.constant 0 : index
    %151 = vector.load %arg22[%c0_72, %c0_73] : memref<128x128xbf16, #tpu.memory_space<vmem>>, vector<128x128xbf16>
    %c0_74 = arith.constant 0 : index
    %c0_75 = arith.constant 0 : index
    %152 = vector.load %arg23[%c0_74, %c0_75] : memref<1x128xf32, #tpu.memory_space<vmem>>, vector<1x128xf32>
    %153 = arith.truncf %144 : vector<8x128xf32> to vector<8x128xbf16>
    %154 = arith.truncf %8 : vector<8x128xf32> to vector<8x128xbf16>
    %cst_76 = arith.constant dense<0.000000e+00> : vector<8x128xf32>
    %155 = tpu.matmul %153, %145, %cst_76 {dimension_numbers = #tpu.dot_dimension_numbers<[1], [0], [0], [1], [0, 0, 1, 1], [], []>} : vector<8x128xbf16>, vector<128x128xbf16>, vector<8x128xf32> -> vector<8x128xf32>
    %156 = vector.broadcast %146 : vector<1x128xf32> to vector<8x128xf32>
    %157 = arith.addf %155, %156 : vector<8x128xf32>
    %cst_77 = arith.constant dense<0.000000e+00> : vector<8x128xf32>
    %158 = tpu.matmul %154, %147, %cst_77 {dimension_numbers = #tpu.dot_dimension_numbers<[1], [0], [0], [1], [0, 0, 1, 1], [], []>} : vector<8x128xbf16>, vector<128x128xbf16>, vector<8x128xf32> -> vector<8x128xf32>
    %159 = vector.broadcast %148 : vector<1x128xf32> to vector<8x128xf32>
    %160 = arith.addf %158, %159 : vector<8x128xf32>
    %cst_78 = arith.constant dense<0.000000e+00> : vector<8x128xf32>
    %161 = tpu.matmul %154, %149, %cst_78 {dimension_numbers = #tpu.dot_dimension_numbers<[1], [0], [0], [1], [0, 0, 1, 1], [], []>} : vector<8x128xbf16>, vector<128x128xbf16>, vector<8x128xf32> -> vector<8x128xf32>
    %162 = vector.broadcast %150 : vector<1x128xf32> to vector<8x128xf32>
    %163 = arith.addf %161, %162 : vector<8x128xf32>
    %cst_79 = arith.constant 0.176776692 : f32
    %164 = vector.broadcast %cst_79 : f32 to vector<8x128xf32>
    %165 = arith.mulf %157, %164 : vector<8x128xf32>
    %166 = arith.truncf %165 : vector<8x128xf32> to vector<8x128xbf16>
    %167 = arith.truncf %160 : vector<8x128xf32> to vector<8x128xbf16>
    %168 = arith.truncf %163 : vector<8x128xf32> to vector<8x128xbf16>
    %169 = vector.extract_strided_slice %166 {offsets = [0, 0], sizes = [8, 32], strides = [1, 1]} : vector<8x128xbf16> to vector<8x32xbf16>
    %170 = vector.extract_strided_slice %167 {offsets = [0, 0], sizes = [8, 32], strides = [1, 1]} : vector<8x128xbf16> to vector<8x32xbf16>
    %171 = vector.extract_strided_slice %168 {offsets = [0, 0], sizes = [8, 32], strides = [1, 1]} : vector<8x128xbf16> to vector<8x32xbf16>
    "tpu.trace_start"() <{level = 10 : i32, message = "qk,sk->qs"}> : () -> ()
    %cst_80 = arith.constant dense<0.000000e+00> : vector<8x8xf32>
    %172 = tpu.matmul %169, %170, %cst_80 {dimension_numbers = #tpu.dot_dimension_numbers<[1], [1], [0], [0], [0, 0, 1, 0], [], []>} : vector<8x32xbf16>, vector<8x32xbf16>, vector<8x8xf32> -> vector<8x8xf32>
    "tpu.trace_stop"() : () -> ()
    %173 = vector.broadcast %12 : vector<1x8xf32> to vector<8x8xf32>
    %174 = arith.addf %172, %173 : vector<8x8xf32>
    %cst_81 = arith.constant dense<0xFF800000> : vector<8xf32>
    %175 = vector.multi_reduction <maximumf>, %174, %cst_81 [1] : vector<8x8xf32> to vector<8xf32>
    %176 = vector.shape_cast %175 : vector<8xf32> to vector<8x1xf32>
    %177 = vector.broadcast %176 : vector<8x1xf32> to vector<8x8xf32>
    %178 = arith.subf %174, %177 : vector<8x8xf32>
    %179 = math.exp %178 : vector<8x8xf32>
    %cst_82 = arith.constant dense<0.000000e+00> : vector<8xf32>
    %180 = vector.multi_reduction <add>, %179, %cst_82 [1] : vector<8x8xf32> to vector<8xf32>
    %181 = vector.shape_cast %180 : vector<8xf32> to vector<8x1xf32>
    %182 = tpu.reciprocal %181 {approx = true} : vector<8x1xf32> -> vector<8x1xf32>
    %183 = vector.broadcast %182 : vector<8x1xf32> to vector<8x8xf32>
    %184 = arith.mulf %179, %183 : vector<8x8xf32>
    %185 = arith.truncf %184 : vector<8x8xf32> to vector<8x8xbf16>
    %cst_83 = arith.constant dense<0.000000e+00> : vector<8x32xf32>
    %186 = tpu.matmul %185, %171, %cst_83 {dimension_numbers = #tpu.dot_dimension_numbers<[1], [0], [0], [1], [0, 0, 1, 1], [], []>} : vector<8x8xbf16>, vector<8x32xbf16>, vector<8x32xf32> -> vector<8x32xf32>
    %187 = vector.extract_strided_slice %166 {offsets = [0, 32], sizes = [8, 32], strides = [1, 1]} : vector<8x128xbf16> to vector<8x32xbf16>
    %188 = vector.extract_strided_slice %167 {offsets = [0, 32], sizes = [8, 32], strides = [1, 1]} : vector<8x128xbf16> to vector<8x32xbf16>
    %189 = vector.extract_strided_slice %168 {offsets = [0, 32], sizes = [8, 32], strides = [1, 1]} : vector<8x128xbf16> to vector<8x32xbf16>
    "tpu.trace_start"() <{level = 10 : i32, message = "qk,sk->qs"}> : () -> ()
    %cst_84 = arith.constant dense<0.000000e+00> : vector<8x8xf32>
    %190 = tpu.matmul %187, %188, %cst_84 {dimension_numbers = #tpu.dot_dimension_numbers<[1], [1], [0], [0], [0, 0, 1, 0], [], []>} : vector<8x32xbf16>, vector<8x32xbf16>, vector<8x8xf32> -> vector<8x8xf32>
    "tpu.trace_stop"() : () -> ()
    %191 = vector.broadcast %12 : vector<1x8xf32> to vector<8x8xf32>
    %192 = arith.addf %190, %191 : vector<8x8xf32>
    %cst_85 = arith.constant dense<0xFF800000> : vector<8xf32>
    %193 = vector.multi_reduction <maximumf>, %192, %cst_85 [1] : vector<8x8xf32> to vector<8xf32>
    %194 = vector.shape_cast %193 : vector<8xf32> to vector<8x1xf32>
    %195 = vector.broadcast %194 : vector<8x1xf32> to vector<8x8xf32>
    %196 = arith.subf %192, %195 : vector<8x8xf32>
    %197 = math.exp %196 : vector<8x8xf32>
    %cst_86 = arith.constant dense<0.000000e+00> : vector<8xf32>
    %198 = vector.multi_reduction <add>, %197, %cst_86 [1] : vector<8x8xf32> to vector<8xf32>
    %199 = vector.shape_cast %198 : vector<8xf32> to vector<8x1xf32>
    %200 = tpu.reciprocal %199 {approx = true} : vector<8x1xf32> -> vector<8x1xf32>
    %201 = vector.broadcast %200 : vector<8x1xf32> to vector<8x8xf32>
    %202 = arith.mulf %197, %201 : vector<8x8xf32>
    %203 = arith.truncf %202 : vector<8x8xf32> to vector<8x8xbf16>
    %cst_87 = arith.constant dense<0.000000e+00> : vector<8x32xf32>
    %204 = tpu.matmul %203, %189, %cst_87 {dimension_numbers = #tpu.dot_dimension_numbers<[1], [0], [0], [1], [0, 0, 1, 1], [], []>} : vector<8x8xbf16>, vector<8x32xbf16>, vector<8x32xf32> -> vector<8x32xf32>
    %205 = vector.extract_strided_slice %166 {offsets = [0, 64], sizes = [8, 32], strides = [1, 1]} : vector<8x128xbf16> to vector<8x32xbf16>
    %206 = vector.extract_strided_slice %167 {offsets = [0, 64], sizes = [8, 32], strides = [1, 1]} : vector<8x128xbf16> to vector<8x32xbf16>
    %207 = vector.extract_strided_slice %168 {offsets = [0, 64], sizes = [8, 32], strides = [1, 1]} : vector<8x128xbf16> to vector<8x32xbf16>
    "tpu.trace_start"() <{level = 10 : i32, message = "qk,sk->qs"}> : () -> ()
    %cst_88 = arith.constant dense<0.000000e+00> : vector<8x8xf32>
    %208 = tpu.matmul %205, %206, %cst_88 {dimension_numbers = #tpu.dot_dimension_numbers<[1], [1], [0], [0], [0, 0, 1, 0], [], []>} : vector<8x32xbf16>, vector<8x32xbf16>, vector<8x8xf32> -> vector<8x8xf32>
    "tpu.trace_stop"() : () -> ()
    %209 = vector.broadcast %12 : vector<1x8xf32> to vector<8x8xf32>
    %210 = arith.addf %208, %209 : vector<8x8xf32>
    %cst_89 = arith.constant dense<0xFF800000> : vector<8xf32>
    %211 = vector.multi_reduction <maximumf>, %210, %cst_89 [1] : vector<8x8xf32> to vector<8xf32>
    %212 = vector.shape_cast %211 : vector<8xf32> to vector<8x1xf32>
    %213 = vector.broadcast %212 : vector<8x1xf32> to vector<8x8xf32>
    %214 = arith.subf %210, %213 : vector<8x8xf32>
    %215 = math.exp %214 : vector<8x8xf32>
    %cst_90 = arith.constant dense<0.000000e+00> : vector<8xf32>
    %216 = vector.multi_reduction <add>, %215, %cst_90 [1] : vector<8x8xf32> to vector<8xf32>
    %217 = vector.shape_cast %216 : vector<8xf32> to vector<8x1xf32>
    %218 = tpu.reciprocal %217 {approx = true} : vector<8x1xf32> -> vector<8x1xf32>
    %219 = vector.broadcast %218 : vector<8x1xf32> to vector<8x8xf32>
    %220 = arith.mulf %215, %219 : vector<8x8xf32>
    %221 = arith.truncf %220 : vector<8x8xf32> to vector<8x8xbf16>
    %cst_91 = arith.constant dense<0.000000e+00> : vector<8x32xf32>
    %222 = tpu.matmul %221, %207, %cst_91 {dimension_numbers = #tpu.dot_dimension_numbers<[1], [0], [0], [1], [0, 0, 1, 1], [], []>} : vector<8x8xbf16>, vector<8x32xbf16>, vector<8x32xf32> -> vector<8x32xf32>
    %223 = vector.extract_strided_slice %166 {offsets = [0, 96], sizes = [8, 32], strides = [1, 1]} : vector<8x128xbf16> to vector<8x32xbf16>
    %224 = vector.extract_strided_slice %167 {offsets = [0, 96], sizes = [8, 32], strides = [1, 1]} : vector<8x128xbf16> to vector<8x32xbf16>
    %225 = vector.extract_strided_slice %168 {offsets = [0, 96], sizes = [8, 32], strides = [1, 1]} : vector<8x128xbf16> to vector<8x32xbf16>
    "tpu.trace_start"() <{level = 10 : i32, message = "qk,sk->qs"}> : () -> ()
    %cst_92 = arith.constant dense<0.000000e+00> : vector<8x8xf32>
    %226 = tpu.matmul %223, %224, %cst_92 {dimension_numbers = #tpu.dot_dimension_numbers<[1], [1], [0], [0], [0, 0, 1, 0], [], []>} : vector<8x32xbf16>, vector<8x32xbf16>, vector<8x8xf32> -> vector<8x8xf32>
    "tpu.trace_stop"() : () -> ()
    %227 = vector.broadcast %12 : vector<1x8xf32> to vector<8x8xf32>
    %228 = arith.addf %226, %227 : vector<8x8xf32>
    %cst_93 = arith.constant dense<0xFF800000> : vector<8xf32>
    %229 = vector.multi_reduction <maximumf>, %228, %cst_93 [1] : vector<8x8xf32> to vector<8xf32>
    %230 = vector.shape_cast %229 : vector<8xf32> to vector<8x1xf32>
    %231 = vector.broadcast %230 : vector<8x1xf32> to vector<8x8xf32>
    %232 = arith.subf %228, %231 : vector<8x8xf32>
    %233 = math.exp %232 : vector<8x8xf32>
    %cst_94 = arith.constant dense<0.000000e+00> : vector<8xf32>
    %234 = vector.multi_reduction <add>, %233, %cst_94 [1] : vector<8x8xf32> to vector<8xf32>
    %235 = vector.shape_cast %234 : vector<8xf32> to vector<8x1xf32>
    %236 = tpu.reciprocal %235 {approx = true} : vector<8x1xf32> -> vector<8x1xf32>
    %237 = vector.broadcast %236 : vector<8x1xf32> to vector<8x8xf32>
    %238 = arith.mulf %233, %237 : vector<8x8xf32>
    %239 = arith.truncf %238 : vector<8x8xf32> to vector<8x8xbf16>
    %cst_95 = arith.constant dense<0.000000e+00> : vector<8x32xf32>
    %240 = tpu.matmul %239, %225, %cst_95 {dimension_numbers = #tpu.dot_dimension_numbers<[1], [0], [0], [1], [0, 0, 1, 1], [], []>} : vector<8x8xbf16>, vector<8x32xbf16>, vector<8x32xf32> -> vector<8x32xf32>
    %241 = tpu.concatenate %186, %204, %222, %240 in 1 : vector<8x32xf32>, vector<8x32xf32>, vector<8x32xf32>, vector<8x32xf32> -> vector<8x128xf32>
    %242 = arith.truncf %241 : vector<8x128xf32> to vector<8x128xbf16>
    %cst_96 = arith.constant dense<0.000000e+00> : vector<8x128xf32>
    %243 = tpu.matmul %242, %151, %cst_96 {dimension_numbers = #tpu.dot_dimension_numbers<[1], [0], [0], [1], [0, 0, 1, 1], [], []>} : vector<8x128xbf16>, vector<128x128xbf16>, vector<8x128xf32> -> vector<8x128xf32>
    %244 = vector.broadcast %152 : vector<1x128xf32> to vector<8x128xf32>
    %245 = arith.addf %243, %244 : vector<8x128xf32>
    %246 = arith.addf %144, %245 : vector<8x128xf32>
    %c0_97 = arith.constant 0 : index
    %c0_98 = arith.constant 0 : index
    %247 = vector.load %arg24[%c0_97, %c0_98] : memref<1x128xf32, #tpu.memory_space<vmem>>, vector<1x128xf32>
    %c0_99 = arith.constant 0 : index
    %c0_100 = arith.constant 0 : index
    %248 = vector.load %arg25[%c0_99, %c0_100] : memref<1x128xf32, #tpu.memory_space<vmem>>, vector<1x128xf32>
    %cst_101 = arith.constant dense<0.000000e+00> : vector<8xf32>
    %249 = vector.multi_reduction <add>, %246, %cst_101 [1] : vector<8x128xf32> to vector<8xf32>
    %250 = vector.shape_cast %249 : vector<8xf32> to vector<8x1xf32>
    %cst_102 = arith.constant 1.280000e+02 : f32
    %251 = vector.broadcast %cst_102 : f32 to vector<8x1xf32>
    %252 = arith.divf %250, %251 : vector<8x1xf32>
    %253 = vector.broadcast %252 : vector<8x1xf32> to vector<8x128xf32>
    %254 = arith.subf %246, %253 : vector<8x128xf32>
    %255 = arith.mulf %254, %254 : vector<8x128xf32>
    %cst_103 = arith.constant dense<0.000000e+00> : vector<8xf32>
    %256 = vector.multi_reduction <add>, %255, %cst_103 [1] : vector<8x128xf32> to vector<8xf32>
    %257 = vector.shape_cast %256 : vector<8xf32> to vector<8x1xf32>
    %cst_104 = arith.constant 1.280000e+02 : f32
    %258 = vector.broadcast %cst_104 : f32 to vector<8x1xf32>
    %259 = arith.divf %257, %258 : vector<8x1xf32>
    %260 = vector.broadcast %252 : vector<8x1xf32> to vector<8x128xf32>
    %261 = arith.subf %246, %260 : vector<8x128xf32>
    %cst_105 = arith.constant 9.99999974E-6 : f32
    %262 = vector.broadcast %cst_105 : f32 to vector<8x1xf32>
    %263 = arith.addf %259, %262 : vector<8x1xf32>
    %264 = math.rsqrt %263 : vector<8x1xf32>
    %265 = vector.broadcast %264 : vector<8x1xf32> to vector<8x128xf32>
    %266 = arith.mulf %261, %265 : vector<8x128xf32>
    %267 = vector.broadcast %247 : vector<1x128xf32> to vector<8x128xf32>
    %268 = arith.mulf %266, %267 : vector<8x128xf32>
    %269 = vector.broadcast %248 : vector<1x128xf32> to vector<8x128xf32>
    %270 = arith.addf %268, %269 : vector<8x128xf32>
    %271 = arith.truncf %270 : vector<8x128xf32> to vector<8x128xbf16>
    %c0_106 = arith.constant 0 : index
    %c0_107 = arith.constant 0 : index
    %272 = vector.load %arg26[%c0_106, %c0_107] : memref<128x256xbf16, #tpu.memory_space<vmem>>, vector<128x256xbf16>
    %cst_108 = arith.constant dense<0.000000e+00> : vector<8x256xf32>
    %273 = tpu.matmul %271, %272, %cst_108 {dimension_numbers = #tpu.dot_dimension_numbers<[1], [0], [0], [1], [0, 0, 1, 1], [], []>} : vector<8x128xbf16>, vector<128x256xbf16>, vector<8x256xf32> -> vector<8x256xf32>
    %c0_109 = arith.constant 0 : index
    %c0_110 = arith.constant 0 : index
    %274 = vector.load %arg27[%c0_109, %c0_110] : memref<1x256xf32, #tpu.memory_space<vmem>>, vector<1x256xf32>
    %275 = vector.broadcast %274 : vector<1x256xf32> to vector<8x256xf32>
    %276 = arith.addf %273, %275 : vector<8x256xf32>
    %cst_111 = arith.constant 0.000000e+00 : f32
    %277 = vector.broadcast %cst_111 : f32 to vector<8x256xf32>
    %278 = arith.maximumf %276, %277 : vector<8x256xf32>
    %279 = arith.truncf %278 : vector<8x256xf32> to vector<8x256xbf16>
    %c0_112 = arith.constant 0 : index
    %c0_113 = arith.constant 0 : index
    %280 = vector.load %arg28[%c0_112, %c0_113] : memref<256x128xbf16, #tpu.memory_space<vmem>>, vector<256x128xbf16>
    %cst_114 = arith.constant dense<0.000000e+00> : vector<8x128xf32>
    %281 = tpu.matmul %279, %280, %cst_114 {dimension_numbers = #tpu.dot_dimension_numbers<[1], [0], [0], [1], [0, 0, 1, 1], [], []>} : vector<8x256xbf16>, vector<256x128xbf16>, vector<8x128xf32> -> vector<8x128xf32>
    %c0_115 = arith.constant 0 : index
    %c0_116 = arith.constant 0 : index
    %282 = vector.load %arg29[%c0_115, %c0_116] : memref<1x128xf32, #tpu.memory_space<vmem>>, vector<1x128xf32>
    %283 = vector.broadcast %282 : vector<1x128xf32> to vector<8x128xf32>
    %284 = arith.addf %281, %283 : vector<8x128xf32>
    %285 = arith.addf %270, %284 : vector<8x128xf32>
    %c0_117 = arith.constant 0 : index
    %c0_118 = arith.constant 0 : index
    %286 = vector.load %arg30[%c0_117, %c0_118] : memref<1x128xf32, #tpu.memory_space<vmem>>, vector<1x128xf32>
    %c0_119 = arith.constant 0 : index
    %c0_120 = arith.constant 0 : index
    %287 = vector.load %arg31[%c0_119, %c0_120] : memref<1x128xf32, #tpu.memory_space<vmem>>, vector<1x128xf32>
    %cst_121 = arith.constant dense<0.000000e+00> : vector<8xf32>
    %288 = vector.multi_reduction <add>, %285, %cst_121 [1] : vector<8x128xf32> to vector<8xf32>
    %289 = vector.shape_cast %288 : vector<8xf32> to vector<8x1xf32>
    %cst_122 = arith.constant 1.280000e+02 : f32
    %290 = vector.broadcast %cst_122 : f32 to vector<8x1xf32>
    %291 = arith.divf %289, %290 : vector<8x1xf32>
    %292 = vector.broadcast %291 : vector<8x1xf32> to vector<8x128xf32>
    %293 = arith.subf %285, %292 : vector<8x128xf32>
    %294 = arith.mulf %293, %293 : vector<8x128xf32>
    %cst_123 = arith.constant dense<0.000000e+00> : vector<8xf32>
    %295 = vector.multi_reduction <add>, %294, %cst_123 [1] : vector<8x128xf32> to vector<8xf32>
    %296 = vector.shape_cast %295 : vector<8xf32> to vector<8x1xf32>
    %cst_124 = arith.constant 1.280000e+02 : f32
    %297 = vector.broadcast %cst_124 : f32 to vector<8x1xf32>
    %298 = arith.divf %296, %297 : vector<8x1xf32>
    %299 = vector.broadcast %291 : vector<8x1xf32> to vector<8x128xf32>
    %300 = arith.subf %285, %299 : vector<8x128xf32>
    %cst_125 = arith.constant 9.99999974E-6 : f32
    %301 = vector.broadcast %cst_125 : f32 to vector<8x1xf32>
    %302 = arith.addf %298, %301 : vector<8x1xf32>
    %303 = math.rsqrt %302 : vector<8x1xf32>
    %304 = vector.broadcast %303 : vector<8x1xf32> to vector<8x128xf32>
    %305 = arith.mulf %300, %304 : vector<8x128xf32>
    %306 = vector.broadcast %286 : vector<1x128xf32> to vector<8x128xf32>
    %307 = arith.mulf %305, %306 : vector<8x128xf32>
    %308 = vector.broadcast %287 : vector<1x128xf32> to vector<8x128xf32>
    %309 = arith.addf %307, %308 : vector<8x128xf32>
    %c0_126 = arith.constant 0 : index
    %c0_127 = arith.constant 0 : index
    %c0_128 = arith.constant 0 : index
    %310 = vector.load %arg32[%c0_126, %c0_127, %c0_128] : memref<1x8x128xf32, #tpu.memory_space<vmem>>, vector<1x8x128xf32>
    %311 = vector.shape_cast %310 : vector<1x8x128xf32> to vector<8x128xf32>
    %312 = vector.shape_cast %309 : vector<8x128xf32> to vector<1x8x128xf32>
    tpu.vector_store %arg32[%c0_126, %c0_127, %c0_128], %312 {strides = array<i32>} : memref<1x8x128xf32, #tpu.memory_space<vmem>>, vector<1x8x128xf32>,
    return
  }
  func.func @transform_0(%arg0: i32, %arg1: i32) -> (i32, i32, i32) {
    %c0_i32 = arith.constant 0 : i32
    %c0_i32_0 = arith.constant 0 : i32
    %c0_i32_1 = arith.constant 0 : i32
    return %arg0, %c0_i32, %c0_i32_0 : i32, i32, i32
  }
  func.func @transform_1(%arg0: i32, %arg1: i32) -> (i32, i32, i32) {
    %c0_i32 = arith.constant 0 : i32
    %c0_i32_0 = arith.constant 0 : i32
    %c0_i32_1 = arith.constant 0 : i32
    return %arg0, %c0_i32, %c0_i32_0 : i32, i32, i32
  }
  func.func @transform_2(%arg0: i32, %arg1: i32) -> (i32, i32, i32) {
    %c0_i32 = arith.constant 0 : i32
    %c0_i32_0 = arith.constant 0 : i32
    %c0_i32_1 = arith.constant 0 : i32
    return %arg0, %c0_i32, %c0_i32_0 : i32, i32, i32
  }
  func.func @transform_3(%arg0: i32, %arg1: i32) -> (i32, i32, i32) {
    %c0_i32 = arith.constant 0 : i32
    %c0_i32_0 = arith.constant 0 : i32
    %c0_i32_1 = arith.constant 0 : i32
    return %arg0, %c0_i32, %c0_i32_0 : i32, i32, i32
  }
  func.func @transform_4(%arg0: i32, %arg1: i32) -> (i32, i32) {
    %c0_i32 = arith.constant 0 : i32
    %c0_i32_0 = arith.constant 0 : i32
    %c0_i32_1 = arith.constant 0 : i32
    return %c0_i32, %c0_i32_0 : i32, i32
  }
  func.func @transform_5(%arg0: i32, %arg1: i32) -> (i32, i32) {
    %c0_i32 = arith.constant 0 : i32
    %c0_i32_0 = arith.constant 0 : i32
    %c0_i32_1 = arith.constant 0 : i32
    return %c0_i32, %c0_i32_0 : i32, i32
  }
  func.func @transform_6(%arg0: i32, %arg1: i32) -> (i32, i32) {
    %c0_i32 = arith.constant 0 : i32
    %c0_i32_0 = arith.constant 0 : i32
    %c0_i32_1 = arith.constant 0 : i32
    return %c0_i32, %c0_i32_0 : i32, i32
  }
  func.func @transform_7(%arg0: i32, %arg1: i32) -> (i32, i32) {
    %c0_i32 = arith.constant 0 : i32
    %c0_i32_0 = arith.constant 0 : i32
    %c0_i32_1 = arith.constant 0 : i32
    return %c0_i32, %c0_i32_0 : i32, i32
  }
  func.func @transform_8(%arg0: i32, %arg1: i32) -> (i32, i32) {
    %c0_i32 = arith.constant 0 : i32
    %c0_i32_0 = arith.constant 0 : i32
    %c0_i32_1 = arith.constant 0 : i32
    return %c0_i32, %c0_i32_0 : i32, i32
  }
  func.func @transform_9(%arg0: i32, %arg1: i32) -> (i32, i32) {
    %c0_i32 = arith.constant 0 : i32
    %c0_i32_0 = arith.constant 0 : i32
    %c0_i32_1 = arith.constant 0 : i32
    return %c0_i32, %c0_i32_0 : i32, i32
  }
  func.func @transform_10(%arg0: i32, %arg1: i32) -> (i32, i32) {
    %c0_i32 = arith.constant 0 : i32
    %c0_i32_0 = arith.constant 0 : i32
    %c0_i32_1 = arith.constant 0 : i32
    return %c0_i32, %c0_i32_0 : i32, i32
  }
  func.func @transform_11(%arg0: i32, %arg1: i32) -> (i32, i32) {
    %c0_i32 = arith.constant 0 : i32
    %c0_i32_0 = arith.constant 0 : i32
    %c0_i32_1 = arith.constant 0 : i32
    return %c0_i32, %c0_i32_0 : i32, i32
  }
  func.func @transform_12(%arg0: i32, %arg1: i32) -> (i32, i32) {
    %c0_i32 = arith.constant 0 : i32
    %c0_i32_0 = arith.constant 0 : i32
    %c0_i32_1 = arith.constant 0 : i32
    return %c0_i32, %c0_i32_0 : i32, i32
  }
  func.func @transform_13(%arg0: i32, %arg1: i32) -> (i32, i32) {
    %c0_i32 = arith.constant 0 : i32
    %c0_i32_0 = arith.constant 0 : i32
    %c0_i32_1 = arith.constant 0 : i32
    return %c0_i32, %c0_i32_0 : i32, i32
  }
  func.func @transform_14(%arg0: i32, %arg1: i32) -> (i32, i32) {
    %c0_i32 = arith.constant 0 : i32
    %c0_i32_0 = arith.constant 0 : i32
    %c0_i32_1 = arith.constant 0 : i32
    return %c0_i32, %c0_i32_0 : i32, i32
  }
  func.func @transform_15(%arg0: i32, %arg1: i32) -> (i32, i32) {
    %c0_i32 = arith.constant 0 : i32
    %c0_i32_0 = arith.constant 0 : i32
    %c0_i32_1 = arith.constant 0 : i32
    return %c0_i32, %c0_i32_0 : i32, i32
  }
  func.func @transform_16(%arg0: i32, %arg1: i32) -> (i32, i32) {
    %c0_i32 = arith.constant 0 : i32
    %c0_i32_0 = arith.constant 0 : i32
    %c0_i32_1 = arith.constant 0 : i32
    return %c0_i32, %c0_i32_0 : i32, i32
  }
  func.func @transform_17(%arg0: i32, %arg1: i32) -> (i32, i32) {
    %c0_i32 = arith.constant 0 : i32
    %c0_i32_0 = arith.constant 0 : i32
    %c0_i32_1 = arith.constant 0 : i32
    return %c0_i32, %c0_i32_0 : i32, i32
  }
  func.func @transform_18(%arg0: i32, %arg1: i32) -> (i32, i32) {
    %c0_i32 = arith.constant 0 : i32
    %c0_i32_0 = arith.constant 0 : i32
    %c0_i32_1 = arith.constant 0 : i32
    return %c0_i32, %c0_i32_0 : i32, i32
  }
  func.func @transform_19(%arg0: i32, %arg1: i32) -> (i32, i32) {
    %c0_i32 = arith.constant 0 : i32
    %c0_i32_0 = arith.constant 0 : i32
    %c0_i32_1 = arith.constant 0 : i32
    return %c0_i32, %c0_i32_0 : i32, i32
  }
  func.func @transform_20(%arg0: i32, %arg1: i32) -> (i32, i32) {
    %c0_i32 = arith.constant 0 : i32
    %c0_i32_0 = arith.constant 0 : i32
    %c0_i32_1 = arith.constant 0 : i32
    return %c0_i32, %c0_i32_0 : i32, i32
  }
  func.func @transform_21(%arg0: i32, %arg1: i32) -> (i32, i32) {
    %c0_i32 = arith.constant 0 : i32
    %c0_i32_0 = arith.constant 0 : i32
    %c0_i32_1 = arith.constant 0 : i32
    return %c0_i32, %c0_i32_0 : i32, i32
  }
  func.func @transform_22(%arg0: i32, %arg1: i32) -> (i32, i32) {
    %c0_i32 = arith.constant 0 : i32
    %c0_i32_0 = arith.constant 0 : i32
    %c0_i32_1 = arith.constant 0 : i32
    return %c0_i32, %c0_i32_0 : i32, i32
  }
  func.func @transform_23(%arg0: i32, %arg1: i32) -> (i32, i32) {
    %c0_i32 = arith.constant 0 : i32
    %c0_i32_0 = arith.constant 0 : i32
    %c0_i32_1 = arith.constant 0 : i32
    return %c0_i32, %c0_i32_0 : i32, i32
  }
  func.func @transform_24(%arg0: i32, %arg1: i32) -> (i32, i32) {
    %c0_i32 = arith.constant 0 : i32
    %c0_i32_0 = arith.constant 0 : i32
    %c0_i32_1 = arith.constant 0 : i32
    return %c0_i32, %c0_i32_0 : i32, i32
  }
  func.func @transform_25(%arg0: i32, %arg1: i32) -> (i32, i32) {
    %c0_i32 = arith.constant 0 : i32
    %c0_i32_0 = arith.constant 0 : i32
    %c0_i32_1 = arith.constant 0 : i32
    return %c0_i32, %c0_i32_0 : i32, i32
  }
  func.func @transform_26(%arg0: i32, %arg1: i32) -> (i32, i32) {
    %c0_i32 = arith.constant 0 : i32
    %c0_i32_0 = arith.constant 0 : i32
    %c0_i32_1 = arith.constant 0 : i32
    return %c0_i32, %c0_i32_0 : i32, i32
  }
  func.func @transform_27(%arg0: i32, %arg1: i32) -> (i32, i32) {
    %c0_i32 = arith.constant 0 : i32
    %c0_i32_0 = arith.constant 0 : i32
    %c0_i32_1 = arith.constant 0 : i32
    return %c0_i32, %c0_i32_0 : i32, i32
  }
  func.func @transform_28(%arg0: i32, %arg1: i32) -> (i32, i32) {
    %c0_i32 = arith.constant 0 : i32
    %c0_i32_0 = arith.constant 0 : i32
    %c0_i32_1 = arith.constant 0 : i32
    return %c0_i32, %c0_i32_0 : i32, i32
  }
  func.func @transform_29(%arg0: i32, %arg1: i32) -> (i32, i32) {
    %c0_i32 = arith.constant 0 : i32
    %c0_i32_0 = arith.constant 0 : i32
    %c0_i32_1 = arith.constant 0 : i32
    return %c0_i32, %c0_i32_0 : i32, i32
  }
  func.func @transform_30(%arg0: i32, %arg1: i32) -> (i32, i32, i32) {
    %c0_i32 = arith.constant 0 : i32
    %c0_i32_0 = arith.constant 0 : i32
    return %arg0, %arg1, %c0_i32 : i32, i32, i32
  }
}

</mosaic_0001>

<bundles_post_ra>
// kernel: tpu_custom_call.1
= control target key start
LH: loop header
LB: loop body
LE: loop exit
PB: predicated region body
PF: predicated region fallthrough
CT: control target
= control target key end

     0   :  { %s4419_s6 = smov 1   ;;  %s4420_s10 = smov 2   ;;  %s5121_s0 = inlined_call_operand.smem [shape: u32[31], index: -1, kind: input, shape index: {}] }
   0x1   :  { %s4477_s5 = sld [smem:[%s5121_s0]]   ;;  %s4421_s14 = smov 3  }
   0x2   :  { %s4482_s9 = sld [smem:[%s5121_s0 + %s4419_s6]]   ;;  %s4422_s18 = smov 4  }
   0x3   :  { %s4487_s13 = sld [smem:[%s5121_s0 + %s4420_s10]]   ;;  %s4423_s22 = smov 5  }
   0x4   :  { %s4492_s17 = sld [smem:[%s5121_s0 + %s4421_s14]]   ;;  %s4424_s26 = smov 6  }
   0x5   :  { %s4497_s21 = sld [smem:[%s5121_s0 + %s4422_s18]]   ;;  %s4425_s30 = smov 7  }
   0x6   :  { %s4502_s25 = sld [smem:[%s5121_s0 + %s4423_s22]]   ;;  %s4426_s4 = smov 8  }
   0x7   :  { %s4507_s29 = sld [smem:[%s5121_s0 + %s4424_s26]]   ;;  %s4427_s10 = smov 9  }
   0x8   :  { %5143 = sst [smem:[#allocation35_spill]] %s4482_s9  ;;  %s4428_s15 = smov 10  }
   0x9   :  { %5144 = sst [smem:[#allocation36_spill]] %s4487_s13  ;;  %s4429_s20 = smov 11  }
   0xa   :  { %5145 = sst [smem:[#allocation37_spill]] %s4492_s17  ;;  %s4430_s26 = smov 12  }
   0xb   :  { %5146 = sst [smem:[#allocation38_spill]] %s4497_s21  ;;  %s4431_s1 = smov 13  }
   0xc   :  { %s4512_s3 = sld [smem:[%s5121_s0 + %s4425_s30]]   ;;  %s4432_s7 = smov 14  }
   0xd   :  { %5147 = sst [smem:[#allocation39_spill]] %s4507_s29  ;;  %s4434_s22 = smov 16  }
   0xe   :  { %s4517_s8 = sld [smem:[%s5121_s0 + %s4426_s4]]   ;;  %s4435_s28 = smov 17  }
   0xf   :  { %s4522_s14 = sld [smem:[%s5121_s0 + %s4427_s10]]  }
  0x10   :  { %s4527_s19 = sld [smem:[%s5121_s0 + %s4428_s15]]   ;;  %s4433_s15 = smov 15  }
  0x11   :  { %s4532_s24 = sld [smem:[%s5121_s0 + %s4429_s20]]  }
  0x12   :  { %5148 = sst [smem:[#allocation40_spill]] %s4512_s3 }
  0x13   :  { %s4537_s30 = sld [smem:[%s5121_s0 + %s4430_s26]]  }
  0x14   :  { %5149 = sst [smem:[#allocation41_spill]] %s4517_s8 }
  0x15   :  { %5150 = sst [smem:[#allocation42_spill]] %s4522_s14 }
  0x16   :  { %5151 = sst [smem:[#allocation43_spill]] %s4527_s19 }
  0x17   :  { %5152 = sst [smem:[#allocation44_spill]] %s4532_s24 }
  0x18   :  { %s4542_s6 = sld [smem:[%s5121_s0 + %s4431_s1]]  }
  0x19   :  { %5153 = sst [smem:[#allocation45_spill]] %s4537_s30 }
  0x1a   :  { %s4547_s12 = sld [smem:[%s5121_s0 + %s4432_s7]]   ;;  %s4436_s7 = smov 18  }
  0x1b   :  { %s4552_s20 = sld [smem:[%s5121_s0 + %s4433_s15]]   ;;  %s4437_s15 = smov 19  }
  0x1c   :  { %s4557_s27 = sld [smem:[%s5121_s0 + %s4434_s22]]   ;;  %s4438_s22 = smov 20  }
  0x1d   :  { %s4562_s4 = sld [smem:[%s5121_s0 + %s4435_s28]]   ;;  %s4439_s28 = smov 21  }
  0x1e   :  { %5154 = sst [smem:[#allocation46_spill]] %s4542_s6 }
  0x1f   :  { %s4567_s17 = sld [smem:[%s5121_s0 + %s4436_s7]]   ;;  %s4440_s7 = smov 22  }
  0x20   :  { %5155 = sst [smem:[#allocation47_spill]] %s4547_s12 }
  0x21   :  { %5156 = sst [smem:[#allocation48_spill]] %s4552_s20 }
  0x22   :  { %5157 = sst [smem:[#allocation49_spill]] %s4557_s27 }
  0x23   :  { %5158 = sst [smem:[#allocation50_spill]] %s4562_s4 }
  0x24   :  { %s4572_s20 = sld [smem:[%s5121_s0 + %s4437_s15]]   ;;  %s4441_s15 = smov 23  }
  0x25   :  { %s4577_s6 = sld [smem:[%s5121_s0 + %s4438_s22]]   ;;  %s4442_s22 = smov 24  }
  0x26   :  { %s4582_s4 = sld [smem:[%s5121_s0 + %s4439_s28]]   ;;  %s4443_s28 = smov 25  }
  0x27   :  { %s4587_s30 = sld [smem:[%s5121_s0 + %s4440_s7]]   ;;  %s4444_s7 = smov 26  }
  0x28   :  { %s4597_s24 = sld [smem:[%s5121_s0 + %s4442_s22]]   ;;  %s4446_s22 = smov 28  }
  0x29   :  { %s4617_s14 = sld [smem:[%s5121_s0 + %s4446_s22]]  }
  0x2a   :  { %5159 = sst [smem:[#allocation51_spill]] %s4572_s20 }
  0x2b   :  { %5160 = sst [smem:[#allocation52_spill]] %s4577_s6 }
  0x2c   :  { %5161 = sst [smem:[#allocation53_spill]] %s4582_s4 }
  0x2d   :  { %5162 = sst [smem:[#allocation54_spill]] %s4587_s30 }
  0x2e   :  { %s4592_s20 = sld [smem:[%s5121_s0 + %s4441_s15]]   ;;  %s4445_s15 = smov 27  }
  0x2f   :  { %s4602_s4 = sld [smem:[%s5121_s0 + %s4443_s28]]   ;;  %s4447_s28 = smov 29  }
  0x30   :  { %s4607_s30 = sld [smem:[%s5121_s0 + %s4444_s7]]   ;;  %s4448_s7 = smov 30  }
  0x31   :  { %5166 = sst [smem:[#allocation58_spill]] %s4617_s14 }
  0x32   :  { %s4627_s3 = sld [smem:[%s5121_s0 + %s4448_s7]]  }
  0x34   :  { %5163 = sst [smem:[#allocation55_spill]] %s4592_s20 }
  0x35   :  { %5164 = sst [smem:[#allocation56_spill]] %s4602_s4 }
  0x36   :  { %s4612_s20 = sld [smem:[%s5121_s0 + %s4445_s15]]  }
  0x37   :  { %s4622_s4 = sld [smem:[%s5121_s0 + %s4447_s28]]  }
  0x38   :  { %5168 = sst [smem:[#allocation60_spill]] %s4627_s3 }
  0x3c   :  { %5165 = sst [smem:[#allocation57_spill]] %s4612_s20 }
  0x3d   :  { %5167 = sst [smem:[#allocation59_spill]] %s4622_s4 }
  0x3e   :  { %66 = vsyncpa [#allocation3], 0 }
  0x3f   :  { %68 = vsyncpa [#allocation3 + $0x1], 0 }
  0x40   :  { %69 = vsyncpa [#allocation6], 0 }
  0x41   :  { %71 = vsyncpa [#allocation6 + $0x1], 0 }
  0x42   :  { %72 = vsyncpa [#allocation9], 0 }
  0x43   :  { %73 = vsyncpa [#allocation12], 0 }
  0x44   :  { %74 = vsyncpa [#allocation15], 0 }
  0x45   :  { %75 = vsyncpa [#allocation18], 0 }
  0x46   :  { %76 = vsyncpa [#allocation21], 0 }
  0x47   :  { %77 = vsyncpa [#allocation24], 0 }
  0x48   :  { %78 = vsyncpa [#allocation4], 0 }
  0x49   :  { %80 = vsyncpa [#allocation4 + $0x1], 0  ;;  %s4629_s15 = smov 0   ;;  %s4631_s16 = smov 0  }
  0x4a   :  { %s4633_s18 = smov 0   ;;  %s4635_s0 = smov 0  }
  0x4b   :  { %s4637_s22 = smov 0   ;;  %s4639_s23 = smov 0  }
  0x4c LB: > { %s5169_s12 = sld [smem:[#allocation47_spill]]  ;;  %s4660_s26 = sadd.s32 4294967295, %s4417_s23   ;;  %s4401_s16 = sphi %s4631_s16, %s5233_s16   ;;  %s4397_s15 = sphi %s4629_s15, %s5232_s15   ;;  %s4417_s23 = sphi %s4639_s23, %s86_s23   ;;  %s4413_s22 = sphi %s4637_s22, %s5235_s22   ;;  %s4409_s0 = sphi %s4635_s0, %s5234_s0   ;;  %s4405_s18 = sphi %s4633_s18, %s5230_s18  }
  0x4d   : > { %s5170_s8 = sld [smem:[#allocation41_spill]]  ;;  %p3076_p0 = scmp.ge.s32.totalorder %s4417_s23, 1 }
  0x4e   : > { %s5171_s9 = sld [smem:[#allocation35_spill]]  ;;  %p5132_p1 = scmp.eq.s32.totalorder %s4660_s26, 0 }
  0x4f   : > { %s5172_s29 = sld [smem:[#allocation39_spill]]  ;;  %p781_p2 = scmp.lt.s32.totalorder %s4417_s23, 3 }
  0x50   : > { %s5173_s27 = sld [smem:[#allocation49_spill]]  ;;  %s4449_s2 = smov [#allocation8]  }
  0x51   : > { %s5174_s19 = sld [smem:[#allocation43_spill]]  ;;  %p4666_p3 = pnand %p3076_p0, %p781_p2 }
  0x52   : > { %s5175_s6 = sld [smem:[#allocation52_spill]]  ;;  %s794_s7 = sshll.u32 %s4449_s2, 4  ;;  %s795_s7 = int_to_ptr.vmem [resolvable:$true] %s794_s7 }
  0x53   : > { %s5176_s21 = sld [smem:[#allocation38_spill]]  ;;  %p3660_p4 = pneg %p4666_p3 }
  0x54   : > { %5177 = sst [smem:[#allocation61_spill]] %s4405_s18 }
  0x55   : > { %5178 = sst [smem:[#allocation62_spill]] %s4409_s0  ;;  %p4674_p5 = pnand %p3660_p4, %p5132_p1 }
  0x56   : > { %s5179_s1 = scalar_select %p4666_p3, 1, 0 }
  0x57   : > { %s818_s11 = sshll.u32 %s5172_s29, 4  ;;  %p4684_p8 = pneg %p4674_p5  ;;  %s4680_s11 = int_to_ptr.hbm [resolvable:$true] %s818_s11 }
  0x58   : > { %5180 = sst [smem:[#allocation63_spill]] %s5179_s1 }
  0x59   : > { %s792_s28 = sshll.u32 %s5176_s21, 4  ;;  %s3894_s2 = scalar_lea.hbm %s5176_s21, 64  ;;  %s793_s28 = int_to_ptr.hbm [resolvable:$true] %s792_s28 }
  0x5a   : > { %s3887_s4 = sshra.s32 %s793_s28, 4  ;;  %s3888_s4 = int_to_ptr.hbm [resolvable:$true] %s3887_s4 }
  0x5b   : > { %s3889_s3 = scalar_lea.hbm %s3888_s4, 64  ;;  %p3895_p11 = scmp.lt.s32.totalorder %s3888_s4, %s5176_s21 }
  0x5c   : > { %p3890_p7 = scmp.ne.s32.totalorder %s3888_s4, %s3889_s3  ;;  %p3896_p12 = scmp.lt.s32.totalorder %s3894_s2, %s3889_s3 }
  0x5e   : > { %p3892_p9 = pnand %p4684_p8, %p3890_p7  ;;  %p3897_p13 = por %p3896_p12, %p3895_p11 }
  0x60   : > { %p3893_p10 = pneg %p3892_p9 }
  0x62   : > { %p3898_p0 = pnand %p3897_p13, %p3893_p10 }
  0x64   : > { %3901 = shalt.err (!%p3898_p0)
}
  0x65   : > { %s5127_s20 = smov 64   ;;  %s5129_s0 = smov 4  }
  0x66   : > { %3663 = dma.hbm_to_vmem [thread:$0]  (!%p4674_p5), %s793_s28, 1024, %s795_s7, [#allocation9], %s5127_s20, %s5127_s20, %s5129_s0  }
  0x67   : > { %s4452_s1 = smov [#allocation11]   ;;  %s852_s4 = sshll.u32 %s5174_s19, 4  ;;  %s4698_s4 = int_to_ptr.hbm [resolvable:$true] %s852_s4 }
  0x68   : > { %s820_s13 = sshll.u32 %s4452_s1, 4  ;;  %s3917_s3 = sshra.s32 %s4680_s11, 4  ;;  %s821_s13 = int_to_ptr.vmem [resolvable:$true] %s820_s13  ;;  %s3918_s3 = int_to_ptr.hbm [resolvable:$true] %s3917_s3 }
  0x69   : > { %s3919_s2 = scalar_lea.hbm %s3918_s3, 64  ;;  %s3924_s21 = scalar_lea.hbm %s5172_s29, 64 }
  0x6a   : > { %p3920_p2 = scmp.ne.s32.totalorder %s3918_s3, %s3919_s2  ;;  %p3925_p9 = scmp.lt.s32.totalorder %s3918_s3, %s5172_s29 }
  0x6b   : > { %p3926_p10 = scmp.lt.s32.totalorder %s3924_s21, %s3919_s2 }
  0x6c   : > { %p3922_p4 = pnand %p3920_p2, %p4684_p8 }
  0x6d   : > { %p3927_p11 = por %p3926_p10, %p3925_p9 }
  0x6e   : > { %p3923_p7 = pneg %p3922_p4 }
  0x70   : > { %p3928_p12 = pnand %p3927_p11, %p3923_p7 }
  0x72   : > { %3931 = shalt.err (!%p3928_p12)
}
  0x73   : > { %3669 = dma.hbm_to_vmem [thread:$0]  (!%p4674_p5), %s4680_s11, 1024, %s821_s13, [#allocation12], %s5127_s20, %s5127_s20, %s5129_s0  }
  0x74   : > { %s892_s28 = sshll.u32 %s5173_s27, 4  ;;  %s4453_s1 = smov [#allocation14]   ;;  %s4712_s28 = int_to_ptr.hbm [resolvable:$true] %s892_s28 }
  0x75   : > { %s854_s7 = sshll.u32 %s4453_s1, 4  ;;  %s3947_s21 = sshra.s32 %s4698_s4, 4  ;;  %s855_s7 = int_to_ptr.vmem [resolvable:$true] %s854_s7  ;;  %s3948_s21 = int_to_ptr.hbm [resolvable:$true] %s3947_s21 }
  0x76   : > { %s3949_s3 = scalar_lea.hbm %s3948_s21, 64  ;;  %s3954_s2 = scalar_lea.hbm %s5174_s19, 64 }
  0x77   : > { %p3950_p13 = scmp.ne.s32.totalorder %s3948_s21, %s3949_s3  ;;  %p3955_p4 = scmp.lt.s32.totalorder %s3948_s21, %s5174_s19 }
  0x78   : > { %p3956_p7 = scmp.lt.s32.totalorder %s3954_s2, %s3949_s3 }
  0x79   : > { %p3952_p0 = pnand %p3950_p13, %p4684_p8 }
  0x7a   : > { %p3957_p9 = por %p3956_p7, %p3955_p4 }
  0x7b   : > { %p3953_p2 = pneg %p3952_p0 }
  0x7d   : > { %p3958_p10 = pnand %p3957_p9, %p3953_p2 }
  0x7f   : > { %3961 = shalt.err (!%p3958_p10)
}
  0x80   : > { %3675 = dma.hbm_to_vmem [thread:$0]  (!%p4674_p5), %s4698_s4, 1024, %s855_s7, [#allocation15], %s5127_s20, %s5127_s20, %s5129_s0  }
  0x81   : > { %s4454_s13 = smov [#allocation17]   ;;  %s926_s1 = sshll.u32 %s5175_s6, 4  ;;  %s4726_s1 = int_to_ptr.hbm [resolvable:$true] %s926_s1 }
  0x82   : > { %s894_s11 = sshll.u32 %s4454_s13, 4  ;;  %s3977_s21 = sshra.s32 %s4712_s28, 4  ;;  %s895_s11 = int_to_ptr.vmem [resolvable:$true] %s894_s11  ;;  %s3978_s21 = int_to_ptr.hbm [resolvable:$true] %s3977_s21 }
  0x83   : > { %s3979_s3 = scalar_lea.hbm %s3978_s21, 64  ;;  %s3984_s2 = scalar_lea.hbm %s5173_s27, 64 }
  0x84   : > { %p3980_p11 = scmp.ne.s32.totalorder %s3978_s21, %s3979_s3  ;;  %p3985_p0 = scmp.lt.s32.totalorder %s3978_s21, %s5173_s27 }
  0x85   : > { %p3986_p2 = scmp.lt.s32.totalorder %s3984_s2, %s3979_s3 }
  0x86   : > { %p3982_p12 = pnand %p3980_p11, %p4684_p8 }
  0x87   : > { %p3987_p4 = por %p3986_p2, %p3985_p0 }
  0x88   : > { %p3983_p13 = pneg %p3982_p12 }
  0x8a   : > { %p3988_p7 = pnand %p3987_p4, %p3983_p13 }
  0x8c   : > { %3991 = shalt.err (!%p3988_p7)
}
  0x8d   : > { %3681 = dma.hbm_to_vmem [thread:$0]  (!%p4674_p5), %s4712_s28, 1024, %s895_s11, [#allocation18], %s5127_s20, %s5127_s20, %s5129_s0  }
  0x8e   : > { %s4455_s4 = smov [#allocation20]   ;;  %s4007_s13 = sshra.s32 %s4726_s1, 4  ;;  %s4008_s13 = int_to_ptr.hbm [resolvable:$true] %s4007_s13 }
  0x8f   : > { %s928_s7 = sshll.u32 %s4455_s4, 4  ;;  %s4009_s21 = scalar_lea.hbm %s4008_s13, 64  ;;  %s929_s7 = int_to_ptr.vmem [resolvable:$true] %s928_s7 }
  0x90   : > { %p4010_p9 = scmp.ne.s32.totalorder %s4008_s13, %s4009_s21  ;;  %s4014_s3 = scalar_lea.hbm %s5175_s6, 64 }
  0x91   : > { %p4015_p12 = scmp.lt.s32.totalorder %s4008_s13, %s5175_s6  ;;  %p4016_p13 = scmp.lt.s32.totalorder %s4014_s3, %s4009_s21 }
  0x92   : > { %p4012_p10 = pnand %p4010_p9, %p4684_p8 }
  0x93   : > { %p4017_p0 = por %p4016_p13, %p4015_p12 }
  0x94   : > { %p4013_p11 = pneg %p4012_p10 }
  0x96   : > { %p4018_p2 = pnand %p4017_p0, %p4013_p11 }
  0x98   : > { %4021 = shalt.err (!%p4018_p2)
}
  0x99   : > { %3687 = dma.hbm_to_vmem [thread:$0]  (!%p4674_p5), %s4726_s1, 1024, %s929_s7, [#allocation21], %s5127_s20, %s5127_s20, %s5129_s0  }
  0x9a   : > { %s3075_s28 = sadd.s32 4294967294, %s4417_s23   ;;  %s98_s11 = sadd.s32 1, %s4413_s22 }
  0x9b   : > { %s105_s2 = sadd.s32 1, %s4405_s18  ;;  %p100_p4 = scmp.ge.s32.totalorder %s98_s11, 2 }
  0x9c   : > { %p112_p7 = scmp.ne.s32.totalorder %s4405_s18, %s4401_s16  ;;  %p113_p9 = scmp.eq.s32.totalorder %s4417_s23, 0 }
  0x9d   : > { %p118_p10 = scmp.ne.s32.totalorder %s4401_s16, %s4397_s15  ;;  %s5237_s11 = smov (%p100_p4, %s98_s11), 0 }
  0x9e   : > { %5183 = sst [smem:[#allocation64_spill]] %s5237_s11  ;;  %p4760_p11 = por %p113_p9, %p112_p7 }
  0x9f   : > { %p4766_p12 = por %p5132_p1, %p118_p10  ;;  %s102_s7 = ssub.s32 %s4413_s22, %s5237_s11 }
  0xa0   : > { %p768_p13 = scmp.eq.s32.totalorder %s4660_s26, 1  ;;  %p103_p0 = scmp.eq.s32.totalorder %s102_s7, 0 }
  0xa1   : > { %p774_p2 = scmp.eq.s32.totalorder %s3075_s28, 1  ;;  %p3719_p4 = scmp.lt.s32.totalorder %s4417_s23, 2 }
  0xa2   : > { %p4773_p6 = por %p768_p13, %p112_p7  ;;  %s4786_s20 = sand.u32 1, %s4405_s18  }
  0xa3   : > { %s4779_s21 = scalar_select %p103_p0, %s4405_s18, %s105_s2  }
  0xa4   : > { %p4781_p9 = por %p774_p2, %p118_p10  ;;  %s5138_s0 = sshll.u32 %s4786_s20, 3 }
  0xa5   : > { %5187 = sst [smem:[#allocation65_spill]] %s4779_s21  ;;  %s5139_s6 = sshll.u32 %s4413_s22, 3 }
  0xa6   : > { %s5188_s3 = scalar_select %p4781_p9, 1, 0 }
  0xa7   : > { %p4792_p1 = pnand %p3719_p4, %p4760_p11  ;;  %s1010_s2 = sand.u32 1, %s4417_s23  }
  0xa8   : > { %s1018_s7 = scalar_lea.hbm %s5171_s9, %s5139_s6  ;;  %s1014_s27 = scalar_lea.vmem [#allocation5], %s5138_s0 }
  0xa9   : > { %s1020_s19 = sshll.u32 %s1018_s7, 4  ;;  %s1022_s29 = sshll.u32 %s1014_s27, 4  ;;  %s1021_s19 = int_to_ptr.hbm [resolvable:$true] %s1020_s19  ;;  %s1023_s29 = int_to_ptr.vmem [resolvable:$true] %s1022_s29 }
  0xaa   : > { %s4802_s11 = scalar_lea.sflag [#allocation6], %s1010_s2  ;;  %s4037_s4 = sshra.s32 %s1021_s19, 4  ;;  %s4038_s4 = int_to_ptr.hbm [resolvable:$true] %s4037_s4 }
  0xab   : > { %s4039_s21 = scalar_lea.hbm %s4038_s4, 8  ;;  %p4041_p10 = pneg %p4792_p1 }
  0xac   : > { %p4040_p7 = scmp.ne.s32.totalorder %s4038_s4, %s4039_s21  ;;  %s4044_s18 = scalar_lea.hbm %s5171_s9, 16 }
  0xad   : > { %p4045_p0 = scmp.lt.s32.totalorder %s4038_s4, %s5171_s9  ;;  %p4046_p2 = scmp.lt.s32.totalorder %s4044_s18, %s4039_s21 }
  0xae   : > { %p4042_p11 = pnand %p4041_p10, %p4040_p7 }
  0xaf   : > { %p4047_p4 = por %p4046_p2, %p4045_p0 }
  0xb0   : > { %p4043_p13 = pneg %p4042_p11 }
  0xb2   : > { %p4048_p9 = pnand %p4047_p4, %p4043_p13 }
  0xb4   : > { %4051 = shalt.err (!%p4048_p9)
}
  0xb5   : > { %3700 = dma.hbm_to_vmem [thread:$0]  (!%p4792_p1), %s1021_s19, 128, %s1023_s29, %s4802_s11  }
  0xb6   : > { %s807_s27 = sshll.u32 %s4502_s25, 4  ;;  %s4456_s2 = smov [#allocation10]   ;;  %s808_s27 = int_to_ptr.hbm [resolvable:$true] %s807_s27 }
  0xb7   : > { %s809_s7 = sshll.u32 %s4456_s2, 4  ;;  %s835_s0 = sshll.u32 %s5170_s8, 4  ;;  %s810_s7 = int_to_ptr.vmem [resolvable:$true] %s809_s7  ;;  %s836_s0 = int_to_ptr.hbm [resolvable:$true] %s835_s0 }
  0xb8   : > { %s4067_s4 = sshra.s32 %s808_s27, 4  ;;  %s4074_s21 = scalar_lea.hbm %s4502_s25, 1  ;;  %s4068_s4 = int_to_ptr.hbm [resolvable:$true] %s4067_s4 }
  0xb9   : > { %s4069_s18 = scalar_lea.hbm %s4068_s4, 1  ;;  %p4075_p13 = scmp.lt.s32.totalorder %s4068_s4, %s4502_s25 }
  0xba   : > { %p4070_p7 = scmp.ne.s32.totalorder %s4068_s4, %s4069_s18  ;;  %p4076_p0 = scmp.lt.s32.totalorder %s4074_s21, %s4069_s18 }
  0xbc   : > { %p4072_p9 = pnand %p4070_p7, %p4684_p8  ;;  %p4077_p2 = por %p4076_p0, %p4075_p13 }
  0xbe   : > { %p4073_p11 = pneg %p4072_p9 }
  0xc0   : > { %p4078_p4 = pnand %p4077_p2, %p4073_p11 }
  0xc2   : > { %4081 = shalt.err (!%p4078_p4)
}
  0xc3   : > { %3666 = dma.hbm_to_vmem [thread:$0]  (!%p4674_p5), %s808_s27, 16, %s810_s7, [#allocation9]  }
  0xc4   : > { %s4457_s29 = smov [#allocation13]   ;;  %s875_s2 = sshll.u32 %s5169_s12, 4  ;;  %s4823_s2 = int_to_ptr.hbm [resolvable:$true] %s875_s2 }
  0xc5   : > { %s837_s19 = sshll.u32 %s4457_s29, 4  ;;  %s4097_s6 = sshra.s32 %s836_s0, 4  ;;  %s838_s19 = int_to_ptr.vmem [resolvable:$true] %s837_s19  ;;  %s4098_s6 = int_to_ptr.hbm [resolvable:$true] %s4097_s6 }
  0xc6   : > { %s4099_s4 = scalar_lea.hbm %s4098_s6, 64  ;;  %s4104_s18 = scalar_lea.hbm %s5170_s8, 64 }
  0xc7   : > { %p4100_p7 = scmp.ne.s32.totalorder %s4098_s6, %s4099_s4  ;;  %p4105_p13 = scmp.lt.s32.totalorder %s4098_s6, %s5170_s8 }
  0xc8   : > { %p4106_p0 = scmp.lt.s32.totalorder %s4104_s18, %s4099_s4 }
  0xc9   : > { %p4102_p9 = pnand %p4100_p7, %p4684_p8 }
  0xca   : > { %p4107_p2 = por %p4106_p0, %p4105_p13 }
  0xcb   : > { %p4103_p11 = pneg %p4102_p9 }
  0xcd   : > { %p4108_p4 = pnand %p4107_p2, %p4103_p11 }
  0xcf   : > { %4111 = shalt.err (!%p4108_p4)
}
  0xd0   : > { %s5190_s27 = smov 4   ;;  %s5191_s7 = smov 64  }
  0xd1   : > { %3672 = dma.hbm_to_vmem [thread:$0]  (!%p4674_p5), %s836_s0, 1024, %s838_s19, [#allocation12], %s5191_s7, %s5191_s7, %s5190_s27  }
  0xd2   : > { %s909_s21 = sshll.u32 %s4567_s17, 4  ;;  %s4458_s29 = smov [#allocation16]   ;;  %s4835_s21 = int_to_ptr.hbm [resolvable:$true] %s909_s21 }
  0xd3   : > { %s877_s9 = sshll.u32 %s4458_s29, 4  ;;  %s4127_s6 = sshra.s32 %s4823_s2, 4  ;;  %s878_s9 = int_to_ptr.vmem [resolvable:$true] %s877_s9  ;;  %s4128_s6 = int_to_ptr.hbm [resolvable:$true] %s4127_s6 }
  0xd4   : > { %s4129_s4 = scalar_lea.hbm %s4128_s6, 64  ;;  %s4134_s18 = scalar_lea.hbm %s5169_s12, 64 }
  0xd5   : > { %p4130_p7 = scmp.ne.s32.totalorder %s4128_s6, %s4129_s4  ;;  %p4135_p13 = scmp.lt.s32.totalorder %s4128_s6, %s5169_s12 }
  0xd6   : > { %p4136_p0 = scmp.lt.s32.totalorder %s4134_s18, %s4129_s4 }
  0xd7   : > { %p4132_p9 = pnand %p4130_p7, %p4684_p8 }
  0xd8   : > { %p4137_p2 = por %p4136_p0, %p4135_p13 }
  0xd9   : > { %p4133_p11 = pneg %p4132_p9 }
  0xdb   : > { %p4138_p4 = pnand %p4137_p2, %p4133_p11 }
  0xdd   : > { %4141 = shalt.err (!%p4138_p4)
}
  0xde   : > { %3678 = dma.hbm_to_vmem [thread:$0]  (!%p4674_p5), %s4823_s2, 1024, %s878_s9, [#allocation15], %s5191_s7, %s5191_s7, %s5190_s27  }
  0xdf   : > { %s4459_s0 = smov [#allocation19]   ;;  %s949_s29 = sshll.u32 %s4597_s24, 4  ;;  %s4849_s29 = int_to_ptr.hbm [resolvable:$true] %s949_s29 }
  0xe0   : > { %s911_s19 = sshll.u32 %s4459_s0, 4  ;;  %s4157_s6 = sshra.s32 %s4835_s21, 4  ;;  %s912_s19 = int_to_ptr.vmem [resolvable:$true] %s911_s19  ;;  %s4158_s6 = int_to_ptr.hbm [resolvable:$true] %s4157_s6 }
  0xe1   : > { %s4159_s4 = scalar_lea.hbm %s4158_s6, 64  ;;  %s4164_s18 = scalar_lea.hbm %s4567_s17, 64 }
  0xe2   : > { %p4160_p7 = scmp.ne.s32.totalorder %s4158_s6, %s4159_s4  ;;  %p4165_p13 = scmp.lt.s32.totalorder %s4158_s6, %s4567_s17 }
  0xe3   : > { %p4166_p0 = scmp.lt.s32.totalorder %s4164_s18, %s4159_s4 }
  0xe4   : > { %p4162_p9 = pnand %p4160_p7, %p4684_p8 }
  0xe5   : > { %p4167_p2 = por %p4166_p0, %p4165_p13 }
  0xe6   : > { %p4163_p11 = pneg %p4162_p9 }
  0xe8   : > { %p4168_p4 = pnand %p4167_p2, %p4163_p11 }
  0xea   : > { %4171 = shalt.err (!%p4168_p4)
}
  0xeb   : > { %3684 = dma.hbm_to_vmem [thread:$0]  (!%p4674_p5), %s4835_s21, 1024, %s912_s19, [#allocation18], %s5191_s7, %s5191_s7, %s5190_s27  }
  0xec   : > { %s4460_s9 = smov [#allocation22]   ;;  %s966_s0 = sshll.u32 %s4607_s30, 4  ;;  %s967_s0 = int_to_ptr.hbm [resolvable:$true] %s966_s0 }
  0xed   : > { %s951_s2 = sshll.u32 %s4460_s9, 4  ;;  %s4187_s6 = sshra.s32 %s4849_s29, 4  ;;  %s952_s2 = int_to_ptr.vmem [resolvable:$true] %s951_s2  ;;  %s4188_s6 = int_to_ptr.hbm [resolvable:$true] %s4187_s6 }
  0xee   : > { %s4189_s4 = scalar_lea.hbm %s4188_s6, 128  ;;  %s4194_s18 = scalar_lea.hbm %s4597_s24, 128 }
  0xef   : > { %p4190_p7 = scmp.ne.s32.totalorder %s4188_s6, %s4189_s4  ;;  %p4195_p13 = scmp.lt.s32.totalorder %s4188_s6, %s4597_s24 }
  0xf0   : > { %p4196_p0 = scmp.lt.s32.totalorder %s4194_s18, %s4189_s4 }
  0xf1   : > { %p4192_p9 = pnand %p4190_p7, %p4684_p8 }
  0xf2   : > { %p4197_p2 = por %p4196_p0, %p4195_p13 }
  0xf3   : > { %p4193_p11 = pneg %p4192_p9 }
  0xf5   : > { %p4198_p4 = pnand %p4197_p2, %p4193_p11 }
  0xf7   : > { %4201 = shalt.err (!%p4198_p4)
}
  0xf8   : > { %s4461_s8 = smov 128   ;;  %s4462_s21 = smov 8  }
  0xf9   : > { %3690 = dma.hbm_to_vmem [thread:$0]  (!%p4674_p5), %s4849_s29, 2048, %s952_s2, [#allocation21], %s4461_s8, %s4461_s8, %s4462_s21  }
  0xfa   : > { %s4463_s19 = smov [#allocation23]   ;;  %s4217_s12 = sshra.s32 %s967_s0, 4  ;;  %s4218_s12 = int_to_ptr.hbm [resolvable:$true] %s4217_s12 }
  0xfb   : > { %s968_s9 = sshll.u32 %s4463_s19, 4  ;;  %s4219_s6 = scalar_lea.hbm %s4218_s12, 128  ;;  %s969_s9 = int_to_ptr.vmem [resolvable:$true] %s968_s9 }
  0xfc   : > { %p4220_p7 = scmp.ne.s32.totalorder %s4218_s12, %s4219_s6  ;;  %s4224_s4 = scalar_lea.hbm %s4607_s30, 128 }
  0xfd   : > { %p4225_p13 = scmp.lt.s32.totalorder %s4218_s12, %s4607_s30  ;;  %p4226_p0 = scmp.lt.s32.totalorder %s4224_s4, %s4219_s6 }
  0xfe   : > { %p4222_p9 = pnand %p4220_p7, %p4684_p8 }
  0xff   : > { %p4227_p2 = por %p4226_p0, %p4225_p13 }
 0x100   : > { %p4223_p11 = pneg %p4222_p9 }
 0x102   : > { %p4228_p4 = pnand %p4227_p2, %p4223_p11 }
 0x104   : > { %4231 = shalt.err (!%p4228_p4)
}
 0x105   : > { %3693 = dma.hbm_to_vmem [thread:$0]  (!%p4674_p5), %s967_s0, 2048, %s969_s9, [#allocation24], %s5191_s7, %s5191_s7, %s5190_s27  }
 0x106   : > { %s5192_s8 = sshll.u32 %s4413_s22, 3  ;;  %s5193_s12 = sshll.u32 %s4786_s20, 3 }
 0x107   : > { %s999_s14 = scalar_lea.hbm %s4477_s5, %s5192_s8  ;;  %s995_s29 = scalar_lea.vmem [#allocation2], %s5193_s12 }
 0x108   : > { %s1003_s2 = sshll.u32 %s995_s29, 4  ;;  %s1001_s18 = sshll.u32 %s999_s14, 4  ;;  %s1004_s2 = int_to_ptr.vmem [resolvable:$true] %s1003_s2  ;;  %s1002_s18 = int_to_ptr.hbm [resolvable:$true] %s1001_s18 }
 0x109   : > { %s992_s10 = scalar_lea.sflag [#allocation3], %s4786_s20  ;;  %s4247_s21 = sshra.s32 %s1002_s18, 4  ;;  %s4248_s21 = int_to_ptr.hbm [resolvable:$true] %s4247_s21 }
 0x10a   : > { %s4249_s19 = scalar_lea.hbm %s4248_s21, 8  ;;  %s4254_s6 = scalar_lea.hbm %s4477_s5, 16 }
 0x10b   : > { %p4250_p8 = scmp.ne.s32.totalorder %s4248_s21, %s4249_s19  ;;  %p4255_p11 = scmp.lt.s32.totalorder %s4248_s21, %s4477_s5 }
 0x10c   : > { %p4256_p5 = scmp.lt.s32.totalorder %s4254_s6, %s4249_s19 }
 0x10d   : > { %p4252_p7 = pnand %p4250_p8, %p4041_p10 }
 0x10e   : > { %p4257_p13 = por %p4256_p5, %p4255_p11 }
 0x10f   : > { %p4253_p9 = pneg %p4252_p7 }
 0x111   : > { %p4258_p0 = pnand %p4257_p13, %p4253_p9 }
 0x113   : > { %4261 = shalt.err (!%p4258_p0)
}
 0x114   : > { %s5194_s27 = sld [smem:[#allocation36_spill]]  ;;  %s1032_s0 = scalar_lea.vmem [#allocation7], %s4786_s20 }
 0x115   : > { %3697 = dma.hbm_to_vmem [thread:$0]  (!%p4792_p1), %s1002_s18, 128, %s1004_s2, %s992_s10  }
 0x116   : > { %s1039_s9 = sshll.u32 %s1032_s0, 4  ;;  %s1040_s9 = int_to_ptr.vmem [resolvable:$true] %s1039_s9 }
 0x11a   : > { %s1035_s7 = scalar_lea.hbm %s5194_s27, %s4413_s22  ;;  %s4284_s12 = scalar_lea.hbm %s5194_s27, 2 }
 0x11b   : > { %s1037_s4 = sshll.u32 %s1035_s7, 4  ;;  %s1038_s4 = int_to_ptr.hbm [resolvable:$true] %s1037_s4 }
 0x11c   : > { %s4277_s8 = sshra.s32 %s1038_s4, 4  ;;  %s4278_s8 = int_to_ptr.hbm [resolvable:$true] %s4277_s8 }
 0x11d   : > { %s4279_s14 = scalar_lea.hbm %s4278_s8, 1  ;;  %p4285_p7 = scmp.lt.s32.totalorder %s4278_s8, %s5194_s27 }
 0x11e   : > { %p4280_p2 = scmp.ne.s32.totalorder %s4278_s8, %s4279_s14  ;;  %p4286_p9 = scmp.lt.s32.totalorder %s4284_s12, %s4279_s14 }
 0x120   : > { %p4282_p4 = pnand %p4280_p2, %p4041_p10  ;;  %p4287_p11 = por %p4286_p9, %p4285_p7 }
 0x122   : > { %p4283_p8 = pneg %p4282_p4 }
 0x124   : > { %p4288_p5 = pnand %p4287_p11, %p4283_p8 }
 0x126   : > { %4291 = shalt.err (!%p4288_p5)
}
 0x127   : > { %3703 = dma.hbm_to_vmem [thread:$0]  (!%p4792_p1), %s1038_s4, 16, %s1040_s9, %s4802_s11  }
 0x128   : > { %1054 = sbr.rel (%p4666_p3) target bundleno = 3836 (0xefc), region = 140  ;;  %s4907_s29 = sand.u32 (!%p4666_p3), 1, %s4401_s16  }
 0x129   : > { %s4910_s2 = sshll.u32 (!%p4666_p3), %s4907_s29, 3  ;;  %s1057_s18 = scalar_lea.sflag (!%p4666_p3), [#allocation3], %s4907_s29 }
 0x12a   : > { %s1060_s10 = scalar_lea.vmem (!%p4666_p3), [#allocation2], %s4910_s2 }
 0x12d   : > { %4360 = dma.done.wait (%p4766_p12), %s1057_s18, 128  }
 0x12e   : > { %4362 = vsyncadd (%p4766_p12), %s1057_s18, 4294967168  ;;  %s1066_s11 = sand.u32 1, %s4660_s26   ;;  %s1070_s21 = scalar_lea.vmem [#allocation5], %s4910_s2 }
 0x12f   : > { %s1067_s28 = scalar_lea.sflag [#allocation6], %s1066_s11 }
 0x130   : > { %4364 = dma.done.wait (%p4766_p12), %s1067_s28, 144  }
 0x131   : > { %4366 = vsyncadd (%p4766_p12), %s1067_s28, 4294967152  ;;  %s1079_s19 = scalar_lea.vmem [#allocation7], %s4907_s29  ;;  %p5196_p1 = scmp.eq.s32.totalorder %s4660_s26, 0 }
 0x133   : > { %4368 = dma.done.wait (%p5196_p1), [#allocation9], 1040   ;;  %p5197_p3 = pmov %p5196_p1 }
 0x134   : > { %p5198_p10 = pmov %p5196_p1 }
 0x135   : > { %4370 = vsyncadd (%p5197_p3), [#allocation9], 4294966256 }
 0x136   : > { %4372 = dma.done.wait (%p5198_p10), [#allocation12], 2048   ;;  %p5199_p13 = pmov %p5196_p1 }
 0x137   : > { %p5200_p0 = pmov %p5196_p1 }
 0x138   : > { %4374 = vsyncadd (%p5199_p13), [#allocation12], 4294965248 }
 0x139   : > { %4376 = dma.done.wait (%p5200_p0), [#allocation15], 2048   ;;  %p5201_p2 = pmov %p5200_p0 }
 0x13a   : > { %p5202_p12 = pmov %p5200_p0 }
 0x13b   : > { %4378 = vsyncadd (%p5201_p2), [#allocation15], 4294965248 }
 0x13c   : > { %4380 = dma.done.wait (%p5202_p12), [#allocation18], 2048   ;;  %p5203_p4 = pmov %p5200_p0 }
 0x13d   : > { %p5204_p8 = pmov %p5200_p0 }
 0x13e   : > { %4382 = vsyncadd (%p5203_p4), [#allocation18], 4294965248 }
 0x13f   : > { %4384 = dma.done.wait (%p5204_p8), [#allocation21], 3072   ;;  %p5205_p7 = pmov %p5200_p0 }
 0x140   : > { %p5206_p9 = pmov %p5200_p0 }
 0x141   : > { %4386 = vsyncadd (%p5205_p7), [#allocation21], 4294964224 }
 0x142   : > { %4388 = dma.done.wait (%p5206_p9), [#allocation24], 2048   ;;  %p5207_p11 = pmov %p5200_p0 }
 0x143   : > { %v3519_v0 = vld [vmem:[#allocation8 + $0x38] sm:$0xff]  ;;  %v3518_v2 = vld [vmem:[#allocation8 + $0x30] sm:$0xff]  ;;  %v3517_v5 = vld [vmem:[#allocation8 + $0x28] sm:$0xff]  ;;  %s5208_s26 = sld [smem:[#allocation40_spill]]  ;;  %vm1513_vm0 = vcmask 261120   ;;  %s4464_s6 = smov 64   ;;  %v1235_v52 = vlaneseq }
 0x144   : > { %4390 = vsyncadd (%p5207_p11), [#allocation24], 4294965248  ;;  %v3527_v1 = vld [vmem:[#allocation11 + $0x38] sm:$0xff]  ;;  %1368 = vmatpush.bf16.msra.mxu0 %v3519_v0  ;;  %v3526_v3 = vld [vmem:[#allocation11 + $0x30] sm:$0xff]  ;;  %s5209_s1 = sld [smem:[#allocation42_spill]]  ;;  %s4465_s7 = smov 96  }
 0x145   : > { %1432 = vmatpush.bf16.msra.mxu1 %v3527_v1  ;;  %v3535_v4 = vld [vmem:[#allocation13 + $0x38] sm:$0xff]  ;;  %v3525_v6 = vld [vmem:[#allocation11 + $0x28] sm:$0xff]  ;;  %v3534_v7 = vld [vmem:[#allocation13 + $0x30] sm:$0xff]  ;;  %s4466_s0 = smov 32   ;;  %vm1549_vm1 = vcmask 1043456   ;;  %v1236_v53 = vshrl.u32 %v1235_v52, 7 }
 0x146   : > { %1496 = vmatpush.bf16.msra.mxu2 %v3535_v4  ;;  %v3516_v8 = vld [vmem:[#allocation8 + $0x20] sm:$0xff]  ;;  %v3533_v10 = vld [vmem:[#allocation13 + $0x28] sm:$0xff]  ;;  %v3515_v11 = vld [vmem:[#allocation8 + $0x18] sm:$0xff]  ;;  %v1240_v54 = vand.u32 127, %v1235_v52  ;;  %v4467_v56 = vmov 0.0   ;;  %vm1533_vm3 = vcmask 64512  }
 0x147   : > { %v3524_v9 = vld [vmem:[#allocation11 + $0x20] sm:$0xff]  ;;  %v3523_v12 = vld [vmem:[#allocation11 + $0x18] sm:$0xff]  ;;  %v3514_v14 = vld [vmem:[#allocation8 + $0x10] sm:$0xff]  ;;  %s5210_s9 = sld [smem:[#allocation44_spill]]  ;;  %vm1756_vm4 = vcmask 523264   ;;  %vm1758_vm5 = vcmask 785408  }
 0x148   : > { %1369 = vmatpush.bf16.msra.mxu0 %v3518_v2  ;;  %v3532_v13 = vld [vmem:[#allocation13 + $0x20] sm:$0xff]  ;;  %v3522_v15 = vld [vmem:[#allocation11 + $0x10] sm:$0xff]  ;;  %v3531_v16 = vld [vmem:[#allocation13 + $0x18] sm:$0xff]  ;;  %vm1241_vm2 = vcmp.gt.s32.totalorder %v1240_v54, %v1236_v53  ;;  %s5211_s4 = sld [smem:[#allocation45_spill]] }
 0x149   : > { %1433 = vmatpush.bf16.msra.mxu1 %v3526_v3  ;;  %v3513_v17 = vld [vmem:[#allocation8 + $0x8] sm:$0xff]  ;;  %v3530_v19 = vld [vmem:[#allocation13 + $0x10] sm:$0xff]  ;;  %v3512_v20 = vld [vmem:[#allocation8] sm:$0xff]  ;;  %v1242_v57 = vsel %vm1241_vm2, -1e+09, %v4467_v56  ;;  %s5212_s8 = sld [smem:[#allocation46_spill]] }
 0x14a   : > { %1497 = vmatpush.bf16.msra.mxu2 %v3534_v7  ;;  %v3521_v18 = vld [vmem:[#allocation11 + $0x8] sm:$0xff]  ;;  %v3520_v21 = vld [vmem:[#allocation11] sm:$0xff]  ;;  %v3830_v26 = vld [vmem:[#allocation10] ss:$0 sm:$0xff]  ;;  %s5213_s14 = sld [smem:[#allocation50_spill]] }
 0x14b   : > { %v4951_v22 = vld [vmem:[%s1060_s10] sm:$0xff]  ;;  %s5214_s12 = sld [smem:[#allocation48_spill]] }
 0x14c   : > { %1370 = vmatpush.bf16.msra.mxu0 %v3517_v5  ;;  %v3529_v23 = vld [vmem:[#allocation13 + $0x8] sm:$0xff]  ;;  %v1315_v24 = vpack.c.bf16 %v4951_v22, %v4951_v22  ;;  %v3528_v25 = vld [vmem:[#allocation13] sm:$0xff]  ;;  %v3831_v27 = vld [vmem:[%s5208_s26] ss:$0 sm:$0xff]  ;;  %s5215_s20 = sld [smem:[#allocation62_spill]] }
 0x14d   : > { %1434 = vmatpush.bf16.msra.mxu1 %v3525_v6  ;;  %v3832_v43 = vld [vmem:[%s5209_s1] ss:$0 sm:$0xff]  ;;  %s5216_s18 = sld [smem:[#allocation37_spill]] }
 0x14e   : > { %1498 = vmatpush.bf16.msra.mxu2 %v3533_v10  ;;  %v3833_v55 = vld [vmem:[%s1079_s19] ss:$0 sm:$0xff]  ;;  %s5217_s28 = sld [smem:[#allocation51_spill]] }
 0x14f   : > { %v1246_v58 = vadd.f32 %v3833_v55, %v1242_v57  ;;  %s5219_s19 = sld [smem:[#allocation54_spill]] }
 0x150   : > { %1371 = vmatpush.bf16.msra.mxu0 %v3516_v8  ;;  %s5220_s26 = sld [smem:[#allocation55_spill]] }
 0x151   : > { %1435 = vmatpush.bf16.msra.mxu1 %v3524_v9  ;;  %s5221_s1 = sld [smem:[#allocation56_spill]] }
 0x152   : > { %1499 = vmatpush.bf16.msra.mxu2 %v3532_v13  ;;  %p1224_p5 = scmp.lt.s32.totalorder %s5215_s20, 1 }
 0x154   : > { %1372 = vmatpush.bf16.msra.mxu0 %v3515_v11  ;;  %s5029_s10 = scalar_select %p1224_p5, %s5215_s20, 1 }
 0x155   : > { %1436 = vmatpush.bf16.msra.mxu1 %v3523_v12 }
 0x156   : > { %1500 = vmatpush.bf16.msra.mxu2 %v3531_v16  ;;  %s1226_s11 = scalar_lea.vmem %s5216_s18, %s5029_s10 }
 0x158   : > { %1373 = vmatpush.bf16.msra.mxu0 %v3514_v14 }
 0x159   : > { %1437 = vmatpush.bf16.msra.mxu1 %v3522_v15 }
 0x15a   : > { %1501 = vmatpush.bf16.msra.mxu2 %v3530_v19 }
 0x15c   : > { %1374 = vmatpush.bf16.msra.mxu0 %v3513_v17 }
 0x15d   : > { %1438 = vmatpush.bf16.msra.mxu1 %v3521_v18 }
 0x15e   : > { %1502 = vmatpush.bf16.msra.mxu2 %v3529_v23 }
 0x160   : > { %1375 = vmatpush.bf16.msra.mxu0 %v3512_v20 }
 0x161   : > { %1439 = vmatpush.bf16.msra.mxu1 %v3520_v21 }
 0x162   : > { %1503 = vmatpush.bf16.msra.mxu2 %v3528_v25 }
 0x163   : > { %1376 = vmatmul.bf16.vlgmr.msra.gmra.mxu0 %v1315_v24 }
 0x164   : > { %1440 = vmatmul.bf16.vlgmr.msra.gmra.mxu1 %v1315_v24 }
 0x165   : > { %1504 = vmatmul.bf16.vlgmr.msra.gmra.mxu2 %v1315_v24 }
 0x1e0   : > { %v1377_v28 = vpop.f32.mrf.mxu0 }
 0x1e1   : > { %v1441_v29 = vpop.f32.mrf.mxu1  ;;  %v1378_v30 = vadd.f32 %v3830_v26, %v1377_v28 }
 0x1e2   : > { %v1442_v31 = vadd.f32 %v3831_v27, %v1441_v29 }
 0x1e3   : > { %v1509_v32 = vmul.f32 0.17677669, %v1378_v30 }
 0x1e4   : > { %v1511_v33 = vpack.c.bf16 %v1442_v31, %v1442_v31 }
 0x1e5   : > { %v1510_v34 = vpack.c.bf16 %v1509_v32, %v1509_v32 }
 0x1e6   : > { %v1572_v35 = vunpack.c.l.b16 %v1511_v33  ;;  %v1518_v36 = vsel %vm1513_vm0, %v1511_v33, 0 }
 0x1e7   : > { %1527 = vmatpush.bf16.xpose.msra.mxu3 %v1518_v36  ;;  %v1567_v40 = vunpack.c.l.b16 %v1510_v34 }
 0x1e8   : > { %v1573_v37 = vpack.c.b16 %v1572_v35, %v1572_v35  ;;  %v1379_v38 = vpop.f32.mrf.mxu0  ;;  %v1505_v42 = vpop.f32.mrf.mxu2 }
 0x1e9   : > { %v1443_v39 = vpop.f32.mrf.mxu1  ;;  %v1568_v41 = vpack.c.b16 %v1567_v40, %v1567_v40  ;;  %v1506_v44 = vadd.f32 %v3832_v43, %v1505_v42 }
 0x1ea   : > { %1633 = vrot.lane.b32.xlu2 %v1573_v37, %s4464_s6  ;;  %1574 = vrot.lane.b32.xlu1 %v1573_v37, %s4465_s7 }
 0x1eb   : > { %v4964_v46 = vpack.c.bf16 %v1506_v44, %v1506_v44 }
 0x1ed   : > { %v1551_v47 = vsel %vm1549_vm1, %v4964_v46, 0  ;;  %v1608_v28 = vunpack.c.l.b16 %v4964_v46 }
 0x1ee   : > { %3204 = vmatmul.msk.bf16.vlgmr.msra.gmra.mxu3 %vm1513_vm0, %v1510_v34 }
 0x1ef   : > { %1560 = vmatpush.bf16.msrb.mxu3 %v1551_v47  ;;  %v1609_v29 = vpack.c.b16 %v1608_v28, %v1608_v28  ;;  %v3559_v28 = vld [vmem:[#allocation17 + $0x38] sm:$0xff] }
 0x1f0   : > { %v1507_v45 = vpop.f32.mrf.mxu2 }
 0x1f2   : > { %1689 = vrot.lane.b32.xlu2 %v1573_v37, %s4466_s0  ;;  %1569 = vrot.lane.b32.xlu1 %v1568_v41, %s4465_s7 }
 0x1fa   : > { %1687 = vrot.lane.b32.xlu1 %v1568_v41, %s4466_s0 }
 0x244   : > { %v1634_v48 = vpop.permute.xlu2 %1633 }
 0x245   : > { %v1639_v49 = vsel %vm1513_vm0, %v1634_v48, 0 }
 0x246   : > { %1648 = vmatpush.bf16.xpose.msrb.mxu2 %v1639_v49 }
 0x24c   : > { %v1690_v7 = vpop.permute.xlu2 %1689 }
 0x24d   : > { %v1695_v9 = vsel %vm1513_vm0, %v1690_v7, 0  ;;  %v3541_v7 = vld [vmem:[#allocation14 + $0x28] sm:$0xff] }
 0x25c   : > { %v1575_v50 = vpop.permute.xlu1 %1574 }
 0x25d   : > { %v1580_v51 = vsel %vm1513_vm0, %v1575_v50, 0 }
 0x25e   : > { %1589 = vmatpush.bf16.xpose.msra.mxu3 %v1580_v51 }
 0x264   : > { %v1570_v11 = vpop.permute.xlu1 %1569 }
 0x26c   : > { %v1688_v12 = vpop.permute.xlu1 %1687 }
 0x271   : > { %v1529_v59 = vpop.f32.mrf.mxu3 }
 0x272   : > { %v1530_v60 = vadd.f32 %v1529_v59, %v1246_v58 }
 0x274   : > { %v1534_v61 = vsel %vm1533_vm3, %v1530_v60, -inf }
 0x275   : > { %1535 = vmax.xlane.f32.xlu0 %v1534_v61 }
 0x279   : > { %v1531_v62 = vpop.f32.mrf.mxu3 }
 0x2e8   : > { %v1536_v63 = vpop.xlane.xlu0 %1535 }
 0x2e9   : > { %v1537_v0 = vsub.f32 %v1530_v60, %v1536_v63 }
 0x2eb   : > { %v1538_v1 = vmul.f32 1.442695, %v1537_v0 }
 0x2ed   : > { %3847 = vpow2.f32 %v1538_v1 }
 0x2f3   : > { %v3848_v2 = vpop.eup %3847 }
 0x2f4   : > { %v1540_v3 = vsel %vm1533_vm3, %v3848_v2, 0.0 }
 0x2f5   : > { %1541 = vadd.xlane.f32.xlu0 %v1540_v3 }
 0x309   : > { %1631 = vrot.lane.b32.xlu0 %v1568_v41, %s4464_s6 }
 0x368   : > { %v1542_v4 = vpop.xlane.xlu0 %1541 }
 0x369   : > { %3849 = vrcp.f32 %v1542_v4 }
 0x36f   : > { %v3850_v5 = vpop.eup %3849 }
 0x370   : > { %v1544_v6 = vmul.f32 %v3850_v5, %v3848_v2  ;;  %v3543_v5 = vld [vmem:[#allocation14 + $0x38] sm:$0xff] }
 0x371   : > { %1812 = vmatpush.bf16.msrb.mxu1 %v3543_v5 }
 0x372   : > { %v1545_v8 = vpack.c.bf16 %v1544_v6, %v1544_v6  ;;  %v3542_v6 = vld [vmem:[#allocation14 + $0x30] sm:$0xff] }
 0x374   : > { %3205 = vmatmul.msk.bf16.vlgmr.msrb.gmra.mxu3 %vm1533_vm3, %v1545_v8  ;;  %v3540_v8 = vld [vmem:[#allocation14 + $0x20] sm:$0xff] }
 0x375   : > { %1704 = vmatpush.bf16.xpose.msrb.mxu3 %v1695_v9  ;;  %1813 = vmatpush.bf16.msrb.mxu1 %v3542_v6  ;;  %v3539_v9 = vld [vmem:[#allocation14 + $0x18] sm:$0xff] }
 0x376   : > { %v3837_v6 = vld [vmem:[%s5213_s14] ss:$0 sm:$0xff] }
 0x379   : > { %1814 = vmatpush.bf16.msrb.mxu1 %v3541_v7 }
 0x37b   : > { %v1632_v10 = vpop.permute.xlu0 %1631 }
 0x37c   : > { %3208 = vmatmul.msk.bf16.vlgmr.msrb.gmra.mxu2 %vm1513_vm0, %v1632_v10  ;;  %v3538_v10 = vld [vmem:[#allocation14 + $0x10] sm:$0xff] }
 0x37d   : > { %1815 = vmatpush.bf16.msrb.mxu1 %v3540_v8 }
 0x381   : > { %1816 = vmatpush.bf16.msrb.mxu1 %v3539_v9 }
 0x384   : > { %3206 = vmatmul.msk.bf16.vlgmr.msra.gmra.mxu3 %vm1513_vm0, %v1570_v11  ;;  %v3537_v11 = vld [vmem:[#allocation14 + $0x8] sm:$0xff] }
 0x385   : > { %1817 = vmatpush.bf16.msrb.mxu1 %v3538_v10  ;;  %2048 = vmatpush.bf16.msra.mxu3 %v3559_v28  ;;  %v3567_v28 = vld [vmem:[#allocation19 + $0x38] sm:$0xff] }
 0x389   : > { %1818 = vmatpush.bf16.msrb.mxu1 %v3537_v11 }
 0x394   : > { %3210 = vmatmul.msk.bf16.vlgmr.msrb.gmra.mxu3 %vm1513_vm0, %v1688_v12  ;;  %v3536_v12 = vld [vmem:[#allocation14] sm:$0xff] }
 0x395   : > { %1819 = vmatpush.bf16.msrb.mxu1 %v3536_v12 }
 0x3f7   : > { %v4980_v13 = vpop.f32.mrf.mxu3 }
 0x3ff   : > { %v1564_v14 = vpop.f32.mrf.mxu3  ;;  %v1650_v15 = vpop.f32.mrf.mxu2 }
 0x400   : > { %v1651_v16 = vadd.f32 %v1650_v15, %v1246_v58 }
 0x402   : > { %v1654_v17 = vsel %vm1533_vm3, %v1651_v16, -inf }
 0x403   : > { %1655 = vmax.xlane.f32.xlu1 %v1654_v17 }
 0x407   : > { %v1591_v18 = vpop.f32.mrf.mxu3  ;;  %v1652_v19 = vpop.f32.mrf.mxu2 }
 0x408   : > { %v1592_v20 = vadd.f32 %v1591_v18, %v1246_v58 }
 0x40a   : > { %v1595_v21 = vsel %vm1533_vm3, %v1592_v20, -inf }
 0x40b   : > { %1596 = vmax.xlane.f32.xlu2 %v1595_v21  ;;  %v3834_v21 = vld [vmem:[%s5210_s9] ss:$0 sm:$0xff] }
 0x40f   : > { %v1593_v23 = vpop.f32.mrf.mxu3 }
 0x417   : > { %v1706_v24 = vpop.f32.mrf.mxu3 }
 0x418   : > { %v1707_v25 = vadd.f32 %v1706_v24, %v1246_v58 }
 0x41a   : > { %v1710_v26 = vsel %vm1533_vm3, %v1707_v25, -inf }
 0x41b   : > { %1711 = vmax.xlane.f32.xlu0 %v1710_v26 }
 0x41f   : > { %v1708_v27 = vpop.f32.mrf.mxu3 }
 0x420   : > { %v4468_v27 = vmov 128.0  }
 0x42f   : > { %1666 = vrot.lane.b32.xlu0 %v1609_v29, %s4464_s6 }
 0x476   : > { %v1656_v30 = vpop.xlane.xlu1 %1655 }
 0x477   : > { %v1657_v31 = vsub.f32 %v1651_v16, %v1656_v30 }
 0x479   : > { %v1658_v32 = vmul.f32 1.442695, %v1657_v31  ;;  %v3557_v31 = vld [vmem:[#allocation17 + $0x28] sm:$0xff] }
 0x47b   : > { %3851 = vpow2.f32 %v1658_v32 }
 0x47e   : > { %v1597_v33 = vpop.xlane.xlu2 %1596 }
 0x47f   : > { %v1598_v34 = vsub.f32 %v1592_v20, %v1597_v33  ;;  %v3556_v33 = vld [vmem:[#allocation17 + $0x20] sm:$0xff] }
 0x481   : > { %v3852_v35 = vpop.eup %3851  ;;  %v1599_v36 = vmul.f32 1.442695, %v1598_v34 }
 0x482   : > { %v1660_v37 = vsel %vm1533_vm3, %v3852_v35, 0.0 }
 0x483   : > { %3853 = vpow2.f32 %v1599_v36  ;;  %1661 = vadd.xlane.f32.xlu1 %v1660_v37 }
 0x489   : > { %v3854_v38 = vpop.eup %3853 }
 0x48a   : > { %v1601_v39 = vsel %vm1533_vm3, %v3854_v38, 0.0 }
 0x48b   : > { %1602 = vadd.xlane.f32.xlu2 %v1601_v39 }
 0x48e   : > { %v1712_v40 = vpop.xlane.xlu0 %1711 }
 0x48f   : > { %v1713_v41 = vsub.f32 %v1707_v25, %v1712_v40 }
 0x491   : > { %v1714_v42 = vmul.f32 1.442695, %v1713_v41 }
 0x493   : > { %3855 = vpow2.f32 %v1714_v42 }
 0x499   : > { %v3856_v43 = vpop.eup %3855 }
 0x49a   : > { %v1716_v44 = vsel %vm1533_vm3, %v3856_v43, 0.0 }
 0x49b   : > { %1717 = vadd.xlane.f32.xlu1 %v1716_v44  ;;  %v3550_v44 = vld [vmem:[#allocation16 + $0x30] sm:$0xff] }
 0x4a1   : > { %v1667_v45 = vpop.permute.xlu0 %1666 }
 0x4a2   : > { %v1672_v46 = vsel %vm1549_vm1, %v1667_v45, 0  ;;  %v3552_v45 = vld [vmem:[#allocation17] sm:$0xff] }
 0x4a3   : > { %1610 = vrot.lane.b32.xlu2 %v1609_v29, %s4465_s7  ;;  %1681 = vmatpush.bf16.msra.mxu2 %v1672_v46  ;;  %v3549_v46 = vld [vmem:[#allocation16 + $0x28] sm:$0xff] }
 0x4b4   : > { %1722 = vrot.lane.b32.xlu1 %v1609_v29, %s4466_s0  ;;  %v3558_v29 = vld [vmem:[#allocation17 + $0x30] sm:$0xff] }
 0x4b5   : > { %2049 = vmatpush.bf16.msra.mxu3 %v3558_v29  ;;  %v3566_v29 = vld [vmem:[#allocation19 + $0x30] sm:$0xff] }
 0x4b9   : > { %2050 = vmatpush.bf16.msra.mxu3 %v3557_v31  ;;  %v3563_v31 = vld [vmem:[#allocation19 + $0x18] sm:$0xff] }
 0x4bd   : > { %2051 = vmatpush.bf16.msra.mxu3 %v3556_v33  ;;  %v3562_v33 = vld [vmem:[#allocation19 + $0x10] sm:$0xff] }
 0x4f6   : > { %v1662_v47 = vpop.xlane.xlu1 %1661 }
 0x4f7   : > { %3857 = vrcp.f32 %v1662_v47  ;;  %v1232_v47 = vld [vmem:[%s1070_s21] sm:$0xff]  ;;  %s5218_s21 = sld [smem:[#allocation53_spill]] }
 0x4fd   : > { %v3858_v48 = vpop.eup %3857 }
 0x4fe   : > { %v1664_v49 = vmul.f32 %v3858_v48, %v3852_v35  ;;  %v1603_v50 = vpop.xlane.xlu2 %1602  ;;  %v3555_v35 = vld [vmem:[#allocation17 + $0x18] sm:$0xff]  ;;  %v5012_v48 = vpack.c.bf16 %v1232_v47, %v1232_v47 }
 0x4ff   : > { %3859 = vrcp.f32 %v1603_v50  ;;  %2052 = vmatpush.bf16.msra.mxu3 %v3555_v35  ;;  %v3547_v50 = vld [vmem:[#allocation16 + $0x18] sm:$0xff] }
 0x500   : > { %v1665_v51 = vpack.c.bf16 %v1664_v49, %v1664_v49  ;;  %v3548_v49 = vld [vmem:[#allocation16 + $0x20] sm:$0xff] }
 0x502   : > { %3209 = vmatmul.msk.bf16.vlgmr.msra.gmra.mxu2 %vm1533_vm3, %v1665_v51  ;;  %v3546_v51 = vld [vmem:[#allocation16 + $0x10] sm:$0xff] }
 0x505   : > { %v3860_v52 = vpop.eup %3859 }
 0x506   : > { %v1605_v53 = vmul.f32 %v3860_v52, %v3854_v38  ;;  %v1611_v54 = vpop.permute.xlu2 %1610  ;;  %v3545_v52 = vld [vmem:[#allocation16 + $0x8] sm:$0xff] }
 0x507   : > { %v1616_v55 = vsel %vm1549_vm1, %v1611_v54, 0 }
 0x508   : > { %1625 = vmatpush.bf16.msrb.mxu0 %v1616_v55  ;;  %v1606_v56 = vpack.c.bf16 %v1605_v53, %v1605_v53  ;;  %v3544_v53 = vld [vmem:[#allocation16] sm:$0xff] }
 0x50b   : > { %3207 = vmatmul.msk.bf16.vlgmr.msrb.gmra.mxu0 %vm1533_vm3, %v1606_v56 }
 0x50e   : > { %v1718_v57 = vpop.xlane.xlu1 %1717 }
 0x50f   : > { %3861 = vrcp.f32 %v1718_v57 }
 0x510   : > { %3863 = vrcp.f32 %v4468_v27 }
 0x515   : > { %v3862_v58 = vpop.eup %3861 }
 0x516   : > { %v1720_v59 = vmul.f32 %v3862_v58, %v3856_v43  ;;  %v3864_v30 = vpop.eup %3863  ;;  %v3553_v43 = vld [vmem:[#allocation17 + $0x8] sm:$0xff] }
 0x517   : > { %v1831_v32 = vmul.f32 128.0, %v3864_v30  ;;  %vm1835_vm6 = vweird.f32 %v3864_v30 }
 0x518   : > { %v1721_v62 = vpack.c.bf16 %v1720_v59, %v1720_v59 }
 0x519   : > { %v1832_v34 = vsub.f32 1.0, %v1831_v32 }
 0x51b   : > { %v1833_v36 = vmul.f32 %v3864_v30, %v1832_v34  ;;  %v3839_v34 = vld [vmem:[%s1226_s11] ss:$0 sm:$0xff] }
 0x51d   : > { %v1834_v37 = vadd.f32 %v3864_v30, %v1833_v36  ;;  %v3561_v36 = vld [vmem:[#allocation19 + $0x8] sm:$0xff] }
 0x51f   : > { %v5007_v38 = vsel %vm1835_vm6, %v3864_v30, %v1834_v37  ;;  %v3564_v30 = vld [vmem:[#allocation19 + $0x20] sm:$0xff] }
 0x526   : > { %v1723_v60 = vpop.permute.xlu1 %1722 }
 0x527   : > { %v1728_v61 = vsel %vm1549_vm1, %v1723_v60, 0 }
 0x528   : > { %1737 = vmatpush.bf16.msra.mxu0 %v1728_v61 }
 0x52b   : > { %3211 = vmatmul.msk.bf16.vlgmr.msra.gmra.mxu0 %vm1533_vm3, %v1721_v62 }
 0x52c   : > { %2112 = vmatpush.bf16.msrb.mxu0 %v3567_v28 }
 0x530   : > { %2113 = vmatpush.bf16.msrb.mxu0 %v3566_v29 }
 0x585   : > { %v1683_v63 = vpop.f32.mrf.mxu2 }
 0x588   : > { %v1627_v0 = vpop.f32.mrf.mxu0 }
 0x589   : > { %1744 = vrot.lane.b32.xlu2 %v1627_v0, %s4466_s0 }
 0x58d   : > { %v1685_v1 = vpop.f32.mrf.mxu2 }
 0x590   : > { %v1629_v2 = vpop.f32.mrf.mxu0 }
 0x591   : > { %1748 = vrot.lane.b32.xlu2 %v1683_v63, %s4464_s6  ;;  %v3835_v63 = vld [vmem:[%s5211_s4] ss:$0 sm:$0xff]  ;;  %s5226_s4 = sld [smem:[#allocation59_spill]] }
 0x592   : > { %v3836_v2 = vld [vmem:[%s5212_s8] ss:$0 sm:$0xff]  ;;  %s3509_s8 = sshll.u32 %s5215_s20, 3  ;;  %s2794_s20 = scalar_lea.sflag [#allocation4], %s4907_s29 }
 0x5a8   : > { %v1739_v3 = vpop.f32.mrf.mxu0 }
 0x5a9   : > { %1752 = vrot.lane.b32.xlu0 %v1739_v3, %s4465_s7 }
 0x5b0   : > { %v1741_v4 = vpop.f32.mrf.mxu0 }
 0x5e3   : > { %v1745_v14 = vpop.permute.xlu2 %1744 }
 0x5e4   : > { %v1755_v16 = vsel %vm1513_vm0, %v4980_v13, %v1745_v14  ;;  %v3551_v13 = vld [vmem:[#allocation16 + $0x38] sm:$0xff] }
 0x5e5   : > { %1984 = vmatpush.bf16.msrb.mxu2 %v3551_v13  ;;  %v3565_v13 = vld [vmem:[#allocation19 + $0x28] sm:$0xff] }
 0x5e6   : > { %2114 = vmatpush.bf16.msrb.mxu0 %v3565_v13 }
 0x5e9   : > { %1985 = vmatpush.bf16.msrb.mxu2 %v3550_v44 }
 0x5ea   : > { %2115 = vmatpush.bf16.msrb.mxu0 %v3564_v30 }
 0x5eb   : > { %v1749_v15 = vpop.permute.xlu2 %1748 }
 0x5ec   : > { %v1757_v17 = vsel %vm1756_vm4, %v1755_v16, %v1749_v15  ;;  %v3838_v15 = vld [vmem:[%s5214_s12] ss:$0 sm:$0xff]  ;;  %s1223_s12 = scalar_lea.vmem [#allocation25], %s4910_s2 }
 0x5ed   : > { %1986 = vmatpush.bf16.msrb.mxu2 %v3549_v46  ;;  %s2807_s18 = sshll.u32 %s1223_s12, 4  ;;  %s2808_s18 = int_to_ptr.vmem [resolvable:$true] %s2807_s18 }
 0x5ee   : > { %2116 = vmatpush.bf16.msrb.mxu0 %v3563_v31 }
 0x5f1   : > { %1987 = vmatpush.bf16.msrb.mxu2 %v3548_v49 }
 0x5f2   : > { %2117 = vmatpush.bf16.msrb.mxu0 %v3562_v33 }
 0x5f5   : > { %1988 = vmatpush.bf16.msrb.mxu2 %v3547_v50 }
 0x5f6   : > { %2118 = vmatpush.bf16.msrb.mxu0 %v3561_v36 }
 0x5f9   : > { %1989 = vmatpush.bf16.msrb.mxu2 %v3546_v51 }
 0x5fd   : > { %1990 = vmatpush.bf16.msrb.mxu2 %v3545_v52 }
 0x601   : > { %1991 = vmatpush.bf16.msrb.mxu2 %v3544_v53  ;;  %v3840_v53 = vld [vmem:[%s5217_s28] ss:$0 sm:$0xff] }
 0x61b   : > { %v1753_v18 = vpop.permute.xlu0 %1752 }
 0x61c   : > { %v1759_v19 = vsel %vm1758_vm5, %v1757_v17, %v1753_v18 }
 0x61d   : > { %v1760_v20 = vpack.c.bf16 %v1759_v19, %v1759_v19 }
 0x61f   : > { %1820 = vmatmul.bf16.vlgmr.msrb.gmra.mxu1 %v1760_v20 }
 0x69c   : > { %v1821_v23 = vpop.f32.mrf.mxu1 }
 0x69d   : > { %v1822_v24 = vadd.f32 %v3834_v21, %v1821_v23 }
 0x69f   : > { %v1825_v25 = vadd.f32 %v1822_v24, %v4951_v22  ;;  %v3554_v22 = vld [vmem:[#allocation17 + $0x10] sm:$0xff] }
 0x6a0   : > { %2053 = vmatpush.bf16.msra.mxu3 %v3554_v22 }
 0x6a1   : > { %1828 = vadd.xlane.f32.xlu2 %v1825_v25 }
 0x6a4   : > { %v1823_v26 = vpop.f32.mrf.mxu1  ;;  %2054 = vmatpush.bf16.msra.mxu3 %v3553_v43 }
 0x6a8   : > { %2055 = vmatpush.bf16.msra.mxu3 %v3552_v45 }
 0x6ab   : > { %2056 = vmatmul.bf16.vlgmr.msra.gmra.mxu3 %v5012_v48 }
 0x714   : > { %v1829_v39 = vpop.xlane.xlu2 %1828 }
 0x715   : > { %v1837_v40 = vmul.f32 %v5007_v38, %v1829_v39 }
 0x717   : > { %v1838_v41 = vsub.f32 %v1825_v25, %v1837_v40 }
 0x719   : > { %v1839_v42 = vmul.f32 %v1838_v41, %v1838_v41 }
 0x71b   : > { %1840 = vadd.xlane.f32.xlu0 %v1839_v42 }
 0x72e   : > { %v2057_v7 = vpop.f32.mrf.mxu3 }
 0x72f   : > { %v2058_v8 = vadd.f32 %v3837_v6, %v2057_v7 }
 0x731   : > { %v2127_v9 = vpack.c.bf16 %v2058_v8, %v2058_v8 }
 0x733   : > { %v2136_v10 = vsel %vm1513_vm0, %v2127_v9, 0  ;;  %v2188_v11 = vunpack.c.l.b16 %v2127_v9 }
 0x734   : > { %2145 = vmatpush.bf16.xpose.msra.mxu1 %v2136_v10 }
 0x735   : > { %v2189_v12 = vpack.c.b16 %v2188_v11, %v2188_v11 }
 0x736   : > { %v2059_v14 = vpop.f32.mrf.mxu3 }
 0x737   : > { %2190 = vrot.lane.b32.xlu1 %v2189_v12, %s4465_s7 }
 0x73f   : > { %2249 = vrot.lane.b32.xlu1 %v2189_v12, %s4464_s6 }
 0x78e   : > { %v1841_v54 = vpop.xlane.xlu0 %1840 }
 0x78f   : > { %v1842_v55 = vmul.f32 %v1841_v54, %v5007_v38 }
 0x791   : > { %v1843_v56 = vadd.f32 1e-05, %v1842_v55 }
 0x793   : > { %3865 = vrsqrt.f32 %v1843_v56  ;;  %vm1850_vm8 = vweird.f32 %v1843_v56 }
 0x799   : > { %v3866_v57 = vpop.eup %3865 }
 0x79a   : > { %v1845_v58 = vmul.f32 %v3866_v57, %v1843_v56  ;;  %vm1851_vm7 = vweird.f32 %v3866_v57 }
 0x79b   : > { %vm1852_vm9 = vmor %vm1850_vm8, %vm1851_vm7 }
 0x79c   : > { %v1846_v59 = vmul.f32 %v3866_v57, %v1845_v58 }
 0x79e   : > { %v1847_v60 = vmul.f32 0.5, %v1846_v59 }
 0x7a0   : > { %v1848_v61 = vsub.f32 1.5, %v1847_v60 }
 0x7a2   : > { %v1849_v62 = vmul.f32 %v3866_v57, %v1848_v61 }
 0x7a4   : > { %v1853_v0 = vsel %vm1852_vm9, %v3866_v57, %v1849_v62 }
 0x7a5   : > { %v1854_v1 = vmul.f32 %v1853_v0, %v1838_v41  ;;  %v3560_v41 = vld [vmem:[#allocation19] sm:$0xff] }
 0x7a6   : > { %2119 = vmatpush.bf16.msrb.mxu0 %v3560_v41 }
 0x7a7   : > { %v1858_v3 = vmul.f32 %v3835_v63, %v1854_v1 }
 0x7a9   : > { %v5018_v4 = vadd.f32 %v3836_v2, %v1858_v3  ;;  %v2191_v24 = vpop.permute.xlu1 %2190  ;;  %2120 = vmatmul.bf16.vlgmr.msrb.gmra.mxu0 %v5012_v48 }
 0x7aa   : > { %v2196_v25 = vsel %vm1513_vm0, %v2191_v24, 0 }
 0x7ab   : > { %v1931_v5 = vpack.c.bf16 %v5018_v4, %v5018_v4  ;;  %2205 = vmatpush.bf16.xpose.msrb.mxu3 %v2196_v25 }
 0x7ad   : > { %1992 = vmatmul.bf16.vlgmr.msrb.gmra.mxu2 %v1931_v5 }
 0x7b1   : > { %v2250_v26 = vpop.permute.xlu1 %2249 }
 0x7b2   : > { %v2255_v27 = vsel %vm1513_vm0, %v2250_v26, 0 }
 0x7b3   : > { %2264 = vmatpush.bf16.xpose.msrb.mxu1 %v2255_v27 }
 0x826   : > { %v2121_v56 = vpop.f32.mrf.mxu0 }
 0x827   : > { %v2122_v57 = vadd.f32 %v3840_v53, %v2121_v56  ;;  %v3573_v56 = vld [vmem:[#allocation20 + $0x28] sm:$0xff] }
 0x829   : > { %v2128_v59 = vpack.c.bf16 %v2122_v57, %v2122_v57  ;;  %v3572_v57 = vld [vmem:[#allocation20 + $0x20] sm:$0xff] }
 0x82b   : > { %v2167_v60 = vsel %vm1549_vm1, %v2128_v59, 0  ;;  %v2224_v5 = vunpack.c.l.b16 %v2128_v59  ;;  %v3570_v59 = vld [vmem:[#allocation20 + $0x10] sm:$0xff] }
 0x82c   : > { %2176 = vmatpush.bf16.msra.mxu2 %v2167_v60  ;;  %v3568_v60 = vld [vmem:[#allocation20] sm:$0xff] }
 0x82d   : > { %v2225_v6 = vpack.c.b16 %v2224_v5, %v2224_v5  ;;  %v3841_v5 = vld [vmem:[%s5218_s21] ss:$0 sm:$0xff] }
 0x82e   : > { %v2123_v63 = vpop.f32.mrf.mxu0 }
 0x830   : > { %v1993_v16 = vpop.f32.mrf.mxu2 }
 0x831   : > { %v1994_v17 = vadd.f32 %v3838_v15, %v1993_v16 }
 0x833   : > { %v2125_v18 = vmul.f32 0.17677669, %v1994_v17 }
 0x835   : > { %v2126_v19 = vpack.c.bf16 %v2125_v18, %v2125_v18 }
 0x837   : > { %v2183_v20 = vunpack.c.l.b16 %v2126_v19  ;;  %3340 = vmatmul.msk.bf16.vlgmr.msra.gmra.mxu1 %vm1513_vm0, %v2126_v19 }
 0x838   : > { %v1995_v21 = vpop.f32.mrf.mxu2 }
 0x839   : > { %v2184_v23 = vpack.c.b16 %v2183_v20, %v2183_v20 }
 0x83b   : > { %2303 = vrot.lane.b32.xlu2 %v2184_v23, %s4466_s0  ;;  %2185 = vrot.lane.b32.xlu1 %v2184_v23, %s4465_s7 }
 0x843   : > { %2305 = vrot.lane.b32.xlu1 %v2189_v12, %s4466_s0 }
 0x84b   : > { %2247 = vrot.lane.b32.xlu1 %v2184_v23, %s4464_s6 }
 0x895   : > { %v2304_v43 = vpop.permute.xlu2 %2303 }
 0x8ad   : > { %v2186_v32 = vpop.permute.xlu1 %2185 }
 0x8ae   : > { %3342 = vmatmul.msk.bf16.vlgmr.msrb.gmra.mxu3 %vm1513_vm0, %v2186_v32 }
 0x8b4   : > { %v2147_v35 = vpop.f32.mrf.mxu1 }
 0x8b5   : > { %v2148_v22 = vadd.f32 %v3839_v34, %v2147_v35  ;;  %v2306_v37 = vpop.permute.xlu1 %2305 }
 0x8b6   : > { %v2311_v39 = vsel %vm1513_vm0, %v2306_v37, 0 }
 0x8b7   : > { %2320 = vmatpush.bf16.xpose.msra.mxu3 %v2311_v39  ;;  %v2151_v40 = vsel %vm1533_vm3, %v2148_v22, -inf }
 0x8b8   : > { %2152 = vmax.xlane.f32.xlu1 %v2151_v40 }
 0x8bc   : > { %v2149_v42 = vpop.f32.mrf.mxu1 }
 0x8bd   : > { %v2248_v44 = vpop.permute.xlu1 %2247 }
 0x8be   : > { %3344 = vmatmul.msk.bf16.vlgmr.msrb.gmra.mxu1 %vm1513_vm0, %v2248_v44  ;;  %3346 = vmatmul.msk.bf16.vlgmr.msra.gmra.mxu3 %vm1513_vm0, %v2304_v43 }
 0x92b   : > { %v2153_v45 = vpop.xlane.xlu1 %2152 }
 0x92c   : > { %v2154_v46 = vsub.f32 %v2148_v22, %v2153_v45 }
 0x92e   : > { %v2155_v47 = vmul.f32 1.442695, %v2154_v46 }
 0x930   : > { %3867 = vpow2.f32 %v2155_v47 }
 0x931   : > { %v2207_v49 = vpop.f32.mrf.mxu3 }
 0x932   : > { %v2208_v61 = vadd.f32 %v3839_v34, %v2207_v49 }
 0x934   : > { %v2211_v0 = vsel %vm1533_vm3, %v2208_v61, -inf }
 0x936   : > { %v3868_v50 = vpop.eup %3867 }
 0x937   : > { %v2157_v51 = vsel %vm1533_vm3, %v3868_v50, 0.0 }
 0x938   : > { %2158 = vadd.xlane.f32.xlu2 %v2157_v51 }
 0x939   : > { %v2209_v52 = vpop.f32.mrf.mxu3 }
 0x93b   : > { %v2266_v54 = vpop.f32.mrf.mxu1 }
 0x93c   : > { %v2267_v55 = vadd.f32 %v3839_v34, %v2266_v54  ;;  %v3575_v54 = vld [vmem:[#allocation20 + $0x38] sm:$0xff] }
 0x93d   : > { %2426 = vmatpush.bf16.msra.mxu1 %v3575_v54 }
 0x93e   : > { %v2270_v58 = vsel %vm1533_vm3, %v2267_v55, -inf }
 0x93f   : > { %2271 = vmax.xlane.f32.xlu0 %v2270_v58  ;;  %v3571_v58 = vld [vmem:[#allocation20 + $0x18] sm:$0xff] }
 0x941   : > { %v2322_v48 = vpop.f32.mrf.mxu3 }
 0x942   : > { %v2323_v2 = vadd.f32 %v3839_v34, %v2322_v48  ;;  %v3569_v48 = vld [vmem:[#allocation20 + $0x8] sm:$0xff] }
 0x943   : > { %v2268_v62 = vpop.f32.mrf.mxu1 }
 0x944   : > { %v2326_v3 = vsel %vm1533_vm3, %v2323_v2, -inf }
 0x947   : > { %2212 = vmax.xlane.f32.xlu0 %v2211_v0 }
 0x949   : > { %v2324_v1 = vpop.f32.mrf.mxu3 }
 0x94f   : > { %2327 = vmax.xlane.f32.xlu0 %v2326_v3 }
 0x963   : > { %2226 = vrot.lane.b32.xlu0 %v2225_v6, %s4465_s7 }
 0x9ab   : > { %v2159_v7 = vpop.xlane.xlu2 %2158 }
 0x9ac   : > { %3869 = vrcp.f32 %v2159_v7 }
 0x9b2   : > { %v3870_v8 = vpop.eup %3869  ;;  %v2272_v9 = vpop.xlane.xlu0 %2271 }
 0x9b3   : > { %v2161_v10 = vmul.f32 %v3870_v8, %v3868_v50  ;;  %v2273_v11 = vsub.f32 %v2267_v55, %v2272_v9  ;;  %v3574_v55 = vld [vmem:[#allocation20 + $0x30] sm:$0xff] }
 0x9b4   : > { %2427 = vmatpush.bf16.msra.mxu1 %v3574_v55  ;;  %v3392_v55 = vld [vmem:[#allocation22 + $0x18] sm:$0xf0] }
 0x9b5   : > { %v2162_v12 = vpack.c.bf16 %v2161_v10, %v2161_v10  ;;  %v2274_v14 = vmul.f32 1.442695, %v2273_v11  ;;  %v3438_v10 = vld [vmem:[#allocation22 + $0x70] sm:$0xf]  ;;  %v3591_v11 = vld [vmem:[#allocation22 + $0x74] sm:$0xf0] }
 0x9b7   : > { %3871 = vpow2.f32 %v2274_v14  ;;  %3341 = vmatmul.msk.bf16.vlgmr.msra.gmra.mxu2 %vm1533_vm3, %v2162_v12  ;;  %v3590_v12 = vld [vmem:[#allocation22 + $0x74] sm:$0xf]  ;;  %v3439_v14 = vor.u32 %v3591_v11, %v3438_v10 }
 0x9b8   : > { %2428 = vmatpush.bf16.msra.mxu1 %v3573_v56  ;;  %v3382_v56 = vld [vmem:[#allocation22] sm:$0xf] }
 0x9ba   : > { %v2213_v15 = vpop.xlane.xlu0 %2212 }
 0x9bb   : > { %v2214_v16 = vsub.f32 %v2208_v61, %v2213_v15  ;;  %v3440_v15 = vld [vmem:[#allocation22 + $0x78] sm:$0xf0] }
 0x9bc   : > { %2429 = vmatpush.bf16.msra.mxu1 %v3572_v57  ;;  %v3577_v57 = vld [vmem:[#allocation22 + $0x4] sm:$0xf0] }
 0x9bd   : > { %v3872_v17 = vpop.eup %3871  ;;  %v2215_v18 = vmul.f32 1.442695, %v2214_v16  ;;  %v3443_v16 = vor.u32 %v3590_v12, %v3440_v15  ;;  %v3595_v12 = vld [vmem:[#allocation23 + $0x18] sm:$0xff] }
 0x9be   : > { %v2276_v19 = vsel %vm1533_vm3, %v3872_v17, 0.0 }
 0x9bf   : > { %3873 = vpow2.f32 %v2215_v18  ;;  %2277 = vadd.xlane.f32.xlu1 %v2276_v19  ;;  %2586 = vmatpush.bf16.msrb.mxu3 %v3443_v16 }
 0x9c0   : > { %2430 = vmatpush.bf16.msra.mxu1 %v3571_v58 }
 0x9c2   : > { %v2328_v20 = vpop.xlane.xlu0 %2327 }
 0x9c3   : > { %v2329_v21 = vsub.f32 %v2323_v2, %v2328_v20 }
 0x9c4   : > { %2431 = vmatpush.bf16.msra.mxu1 %v3570_v59  ;;  %v3576_v59 = vld [vmem:[#allocation22 + $0x4] sm:$0xf] }
 0x9c5   : > { %v3874_v23 = vpop.eup %3873  ;;  %v2330_v24 = vmul.f32 1.442695, %v2329_v21  ;;  %v3589_v21 = vld [vmem:[#allocation22 + $0x64] sm:$0xf0] }
 0x9c6   : > { %v2217_v25 = vsel %vm1533_vm3, %v3874_v23, 0.0 }
 0x9c7   : > { %3875 = vpow2.f32 %v2330_v24  ;;  %2218 = vadd.xlane.f32.xlu0 %v2217_v25  ;;  %v3432_v25 = vld [vmem:[#allocation22 + $0x68] sm:$0xf0] }
 0x9c8   : > { %2432 = vmatpush.bf16.msra.mxu1 %v3569_v48  ;;  %v3384_v48 = vld [vmem:[#allocation22 + $0x8] sm:$0xf0] }
 0x9cc   : > { %2433 = vmatpush.bf16.msra.mxu1 %v3568_v60  ;;  %v3383_v60 = vor.u32 %v3577_v57, %v3382_v56 }
 0x9cd   : > { %v3876_v26 = vpop.eup %3875 }
 0x9ce   : > { %v2332_v27 = vsel %vm1533_vm3, %v3876_v26, 0.0 }
 0x9cf   : > { %2333 = vadd.xlane.f32.xlu1 %v2332_v27  ;;  %v3422_v27 = vld [vmem:[#allocation22 + $0x50] sm:$0xf] }
 0x9d5   : > { %v2227_v28 = vpop.permute.xlu0 %2226 }
 0x9d6   : > { %v2232_v29 = vsel %vm1549_vm1, %v2227_v28, 0  ;;  %v3587_v28 = vld [vmem:[#allocation22 + $0x54] sm:$0xf0] }
 0x9d7   : > { %2241 = vmatpush.bf16.msra.mxu0 %v2232_v29  ;;  %v3586_v29 = vld [vmem:[#allocation22 + $0x54] sm:$0xf] }
 0x9db   : > { %2282 = vrot.lane.b32.xlu0 %v2225_v6, %s4464_s6 }
 0x9e8   : > { %2338 = vrot.lane.b32.xlu1 %v2225_v6, %s4466_s0 }
 0xa32   : > { %v2278_v31 = vpop.xlane.xlu1 %2277 }
 0xa3a   : > { %v2219_v13 = vpop.xlane.xlu0 %2218  ;;  %v2178_v30 = vpop.f32.mrf.mxu2 }
 0xa3b   : > { %3877 = vrcp.f32 %v2219_v13  ;;  %v3423_v13 = vor.u32 %v3587_v28, %v3422_v27 }
 0xa3c   : > { %3879 = vrcp.f32 %v2278_v31 }
 0xa41   : > { %v3878_v32 = vpop.eup %3877 }
 0xa42   : > { %v2221_v33 = vmul.f32 %v3878_v32, %v3874_v23  ;;  %v2180_v34 = vpop.f32.mrf.mxu2  ;;  %v3880_v36 = vpop.eup %3879  ;;  %v3588_v23 = vld [vmem:[#allocation22 + $0x64] sm:$0xf]  ;;  %v3414_v32 = vld [vmem:[#allocation22 + $0x40] sm:$0xf] }
 0xa43   : > { %v2280_v22 = vmul.f32 %v3880_v36, %v3872_v17  ;;  %v2334_v37 = vpop.xlane.xlu1 %2333  ;;  %v3584_v34 = vld [vmem:[#allocation22 + $0x44] sm:$0xf]  ;;  %v3416_v36 = vld [vmem:[#allocation22 + $0x48] sm:$0xf0] }
 0xa44   : > { %v2222_v35 = vpack.c.bf16 %v2221_v33, %v2221_v33  ;;  %3881 = vrcp.f32 %v2334_v37  ;;  %v3585_v33 = vld [vmem:[#allocation22 + $0x44] sm:$0xf0]  ;;  %v3406_v37 = vld [vmem:[#allocation22 + $0x30] sm:$0xf] }
 0xa45   : > { %v2281_v41 = vpack.c.bf16 %v2280_v22, %v2280_v22  ;;  %v3419_v22 = vor.u32 %v3584_v34, %v3416_v36 }
 0xa46   : > { %3343 = vmatmul.msk.bf16.vlgmr.msra.gmra.mxu0 %vm1533_vm3, %v2222_v35  ;;  %v3415_v35 = vor.u32 %v3585_v33, %v3414_v32  ;;  %v2487_v32 = vld [vmem:[%s5221_s1] sm:$0x3] }
 0xa47   : > { %v2489_v33 = vperm.slane %v2487_v32, 0  ;;  %v2490_v34 = vperm.slane %v2487_v32, 1 }
 0xa4a   : > { %v3882_v42 = vpop.eup %3881 }
 0xa4b   : > { %v2336_v43 = vmul.f32 %v3882_v42, %v3876_v26  ;;  %v3435_v26 = vor.u32 %v3588_v23, %v3432_v25  ;;  %v3408_v42 = vld [vmem:[#allocation22 + $0x38] sm:$0xf0] }
 0xa4c   : > { %v3843_v25 = vld [vmem:[%s5220_s26] ss:$0 sm:$0xff] }
 0xa4d   : > { %v2283_v39 = vpop.permute.xlu0 %2282  ;;  %v2337_v46 = vpack.c.bf16 %v2336_v43, %v2336_v43  ;;  %2587 = vmatpush.bf16.msrb.mxu3 %v3435_v26 }
 0xa4e   : > { %v2288_v40 = vsel %vm1549_vm1, %v2283_v39, 0  ;;  %v3583_v39 = vld [vmem:[#allocation22 + $0x34] sm:$0xf0] }
 0xa4f   : > { %2297 = vmatpush.bf16.msrb.mxu2 %v2288_v40  ;;  %v3582_v40 = vld [vmem:[#allocation22 + $0x34] sm:$0xf] }
 0xa50   : > { %v3411_v43 = vor.u32 %v3582_v40, %v3408_v42 }
 0xa52   : > { %3345 = vmatmul.msk.bf16.vlgmr.msrb.gmra.mxu2 %vm1533_vm3, %v2281_v41  ;;  %v3407_v41 = vor.u32 %v3583_v39, %v3406_v37 }
 0xa53   : > { %2573 = vmatpush.bf16.msra.mxu2 %v3439_v14  ;;  %v3603_v14 = vld [vmem:[#allocation23 + $0x58] sm:$0xff] }
 0xa5a   : > { %v2339_v44 = vpop.permute.xlu1 %2338 }
 0xa5b   : > { %v2344_v45 = vsel %vm1549_vm1, %v2339_v44, 0  ;;  %v3398_v44 = vld [vmem:[#allocation22 + $0x20] sm:$0xf] }
 0xa5c   : > { %2353 = vmatpush.bf16.msrb.mxu0 %v2344_v45  ;;  %v3581_v45 = vld [vmem:[#allocation22 + $0x24] sm:$0xf0] }
 0xa5f   : > { %3347 = vmatmul.msk.bf16.vlgmr.msrb.gmra.mxu0 %vm1533_vm3, %v2337_v46  ;;  %v3580_v46 = vld [vmem:[#allocation22 + $0x24] sm:$0xf] }
 0xac3   : > { %v2243_v47 = vpop.f32.mrf.mxu0 }
 0xac4   : > { %2360 = vrot.lane.b32.xlu0 %v2243_v47, %s4466_s0  ;;  %v3399_v47 = vor.u32 %v3581_v45, %v3398_v44  ;;  %s5224_s0 = sld [smem:[#allocation60_spill]] }
 0xaca   : > { %s5225_s9 = smov %s5224_s0  ;;  %s2805_s14 = scalar_lea.hbm %s5224_s0, %s3509_s8 }
 0xacb   : > { %v2245_v49 = vpop.f32.mrf.mxu0  ;;  %s2809_s10 = sshll.u32 %s2805_s14, 4  ;;  %s4327_s21 = scalar_lea.hbm %s5225_s9, 16  ;;  %s2810_s10 = int_to_ptr.hbm [resolvable:$true] %s2809_s10 }
 0xacc   : > { %v3400_v49 = vld [vmem:[#allocation22 + $0x28] sm:$0xf0]  ;;  %s4321_s11 = sshra.s32 %s2810_s10, 4  ;;  %s4322_s11 = int_to_ptr.hbm [resolvable:$true] %s4321_s11 }
 0xacd   : > { %s4323_s28 = scalar_lea.hbm %s4322_s11, 8  ;;  %p4328_p13 = scmp.lt.s32.totalorder %s4322_s11, %s5225_s9 }
 0xace   : > { %p4324_p1 = scmp.ne.s32.totalorder %s4322_s11, %s4323_s28  ;;  %p4329_p0 = scmp.lt.s32.totalorder %s4327_s21, %s4323_s28 }
 0xad0   : > { %p4325_p3 = pnand %p4324_p1, %p4773_p6  ;;  %p4330_p2 = por %p4329_p0, %p4328_p13 }
 0xad2   : > { %p4326_p10 = pneg %p4325_p3 }
 0xad4   : > { %p4331_p12 = pnand %p4330_p2, %p4326_p10 }
 0xad5   : > { %v2299_v50 = vpop.f32.mrf.mxu2 }
 0xad6   : > { %2364 = vrot.lane.b32.xlu2 %v2299_v50, %s4464_s6  ;;  %v3403_v50 = vor.u32 %v3580_v46, %v3400_v49  ;;  %s5222_s6 = sld [smem:[#allocation57_spill]] }
 0xadc   : > { %v2355_v51 = vpop.f32.mrf.mxu0  ;;  %v3844_v44 = vld [vmem:[%s5222_s6] ss:$0 sm:$0xff] }
 0xadd   : > { %v2301_v52 = vpop.f32.mrf.mxu2  ;;  %2368 = vrot.lane.b32.xlu0 %v2355_v51, %s4465_s7  ;;  %v3390_v51 = vld [vmem:[#allocation22 + $0x10] sm:$0xf]  ;;  %s5223_s7 = sld [smem:[#allocation58_spill]] }
 0xade   : > { %v3579_v52 = vld [vmem:[#allocation22 + $0x14] sm:$0xf0] }
 0xadf   : > { %v3391_v54 = vor.u32 %v3579_v52, %v3390_v51 }
 0xae4   : > { %v2357_v53 = vpop.f32.mrf.mxu0 }
 0xae5   : > { %v3578_v53 = vld [vmem:[#allocation22 + $0x14] sm:$0xf] }
 0xae6   : > { %v3395_v58 = vor.u32 %v3578_v53, %v3392_v55 }
 0xb30   : > { %v2365_v63 = vpop.permute.xlu2 %2364 }
 0xb36   : > { %v2361_v61 = vpop.permute.xlu0 %2360 }
 0xb37   : > { %v2371_v62 = vsel %vm1513_vm0, %v2178_v30, %v2361_v61  ;;  %v3424_v30 = vld [vmem:[#allocation22 + $0x58] sm:$0xf0]  ;;  %v3387_v61 = vor.u32 %v3576_v59, %v3384_v48 }
 0xb38   : > { %v2372_v0 = vsel %vm1756_vm4, %v2371_v62, %v2365_v63  ;;  %v3427_v31 = vor.u32 %v3586_v29, %v3424_v30  ;;  %v3599_v62 = vld [vmem:[#allocation23 + $0x38] sm:$0xff]  ;;  %v3593_v29 = vld [vmem:[#allocation23 + $0x8] sm:$0xff]  ;;  %v3592_v30 = vld [vmem:[#allocation23] sm:$0xff] }
 0xb39   : > { %v3607_v63 = vld [vmem:[#allocation23 + $0x78] sm:$0xff]  ;;  %2735 = vmatpush.bf16.msra.mxu0 %v3599_v62 }
 0xb3a   : > { %2588 = vmatpush.bf16.msrb.mxu3 %v3427_v31  ;;  %2748 = vmatpush.bf16.msrb.mxu1 %v3607_v63  ;;  %v3600_v31 = vld [vmem:[#allocation23 + $0x40] sm:$0xff] }
 0xb3e   : > { %2589 = vmatpush.bf16.msrb.mxu3 %v3419_v22 }
 0xb42   : > { %2590 = vmatpush.bf16.msrb.mxu3 %v3411_v43 }
 0xb46   : > { %2591 = vmatpush.bf16.msrb.mxu3 %v3403_v50 }
 0xb4a   : > { %2592 = vmatpush.bf16.msrb.mxu3 %v3395_v58 }
 0xb4e   : > { %2593 = vmatpush.bf16.msrb.mxu3 %v3387_v61 }
 0xb4f   : > { %v2369_v1 = vpop.permute.xlu0 %2368 }
 0xb50   : > { %v2373_v2 = vsel %vm1758_vm5, %v2372_v0, %v2369_v1 }
 0xb51   : > { %v2374_v3 = vpack.c.bf16 %v2373_v2, %v2373_v2  ;;  %v3598_v2 = vld [vmem:[#allocation23 + $0x30] sm:$0xff] }
 0xb52   : > { %2736 = vmatpush.bf16.msra.mxu0 %v3598_v2 }
 0xb53   : > { %2434 = vmatmul.bf16.vlgmr.msra.gmra.mxu1 %v2374_v3  ;;  %v3606_v3 = vld [vmem:[#allocation23 + $0x70] sm:$0xff] }
 0xb54   : > { %2749 = vmatpush.bf16.msrb.mxu1 %v3606_v3  ;;  %v3846_v3 = vld [vmem:[%s5226_s4] ss:$0 sm:$0xff] }
 0xbd0   : > { %v2435_v6 = vpop.f32.mrf.mxu1 }
 0xbd1   : > { %v2436_v7 = vadd.f32 %v3841_v5, %v2435_v6  ;;  %v3597_v6 = vld [vmem:[#allocation23 + $0x28] sm:$0xff] }
 0xbd2   : > { %2737 = vmatpush.bf16.msra.mxu0 %v3597_v6 }
 0xbd3   : > { %v2439_v8 = vadd.f32 %v2436_v7, %v5018_v4  ;;  %v3430_v4 = vld [vmem:[#allocation22 + $0x60] sm:$0xf]  ;;  %v3605_v7 = vld [vmem:[#allocation23 + $0x68] sm:$0xff] }
 0xbd4   : > { %v3431_v24 = vor.u32 %v3589_v21, %v3430_v4  ;;  %2750 = vmatpush.bf16.msrb.mxu1 %v3605_v7  ;;  %v3842_v21 = vld [vmem:[%s5219_s19] ss:$0 sm:$0xff] }
 0xbd5   : > { %2442 = vadd.xlane.f32.xlu0 %v2439_v8 }
 0xbd6   : > { %2574 = vmatpush.bf16.msra.mxu2 %v3431_v24 }
 0xbd8   : > { %v2437_v9 = vpop.f32.mrf.mxu1 }
 0xbd9   : > { %v3604_v9 = vld [vmem:[#allocation23 + $0x60] sm:$0xff] }
 0xbda   : > { %2575 = vmatpush.bf16.msra.mxu2 %v3423_v13  ;;  %2751 = vmatpush.bf16.msrb.mxu1 %v3604_v9  ;;  %v3601_v13 = vld [vmem:[#allocation23 + $0x48] sm:$0xff] }
 0xbde   : > { %2576 = vmatpush.bf16.msra.mxu2 %v3415_v35  ;;  %2752 = vmatpush.bf16.msrb.mxu1 %v3603_v14 }
 0xbe2   : > { %2577 = vmatpush.bf16.msra.mxu2 %v3407_v41 }
 0xbe6   : > { %2578 = vmatpush.bf16.msra.mxu2 %v3399_v47 }
 0xbea   : > { %2579 = vmatpush.bf16.msra.mxu2 %v3391_v54 }
 0xbee   : > { %2580 = vmatpush.bf16.msra.mxu2 %v3383_v60 }
 0xc48   : > { %v2443_v17 = vpop.xlane.xlu0 %2442 }
 0xc49   : > { %v2444_v18 = vmul.f32 %v2443_v17, %v5007_v38  ;;  %v3594_v17 = vld [vmem:[#allocation23 + $0x10] sm:$0xff] }
 0xc4b   : > { %v5074_v19 = vsub.f32 %v2439_v8, %v2444_v18  ;;  %v3596_v8 = vld [vmem:[#allocation23 + $0x20] sm:$0xff]  ;;  %v3602_v18 = vld [vmem:[#allocation23 + $0x50] sm:$0xff] }
 0xc4c   : > { %2738 = vmatpush.bf16.msra.mxu0 %v3596_v8  ;;  %2753 = vmatpush.bf16.msrb.mxu1 %v3602_v18 }
 0xc4d   : > { %v2446_v20 = vmul.f32 %v5074_v19, %v5074_v19 }
 0xc4f   : > { %2447 = vadd.xlane.f32.xlu1 %v2446_v20 }
 0xc50   : > { %2739 = vmatpush.bf16.msra.mxu0 %v3595_v12  ;;  %2754 = vmatpush.bf16.msrb.mxu1 %v3601_v13 }
 0xc54   : > { %2740 = vmatpush.bf16.msra.mxu0 %v3594_v17  ;;  %2755 = vmatpush.bf16.msrb.mxu1 %v3600_v31 }
 0xc58   : > { %2741 = vmatpush.bf16.msra.mxu0 %v3593_v29 }
 0xc5c   : > { %2742 = vmatpush.bf16.msra.mxu0 %v3592_v30 }
 0xcc2   : > { %v2448_v0 = vpop.xlane.xlu1 %2447 }
 0xcc3   : > { %v2449_v1 = vmul.f32 %v2448_v0, %v5007_v38 }
 0xcc5   : > { %v2450_v5 = vadd.f32 1e-05, %v2449_v1  ;;  %v3845_v1 = vld [vmem:[%s5223_s7] ss:$0 sm:$0xff] }
 0xcc7   : > { %3883 = vrsqrt.f32 %v2450_v5  ;;  %vm2457_vm11 = vweird.f32 %v2450_v5 }
 0xccd   : > { %v3884_v10 = vpop.eup %3883 }
 0xcce   : > { %v2452_v11 = vmul.f32 %v3884_v10, %v2450_v5  ;;  %vm2458_vm10 = vweird.f32 %v3884_v10 }
 0xccf   : > { %vm2459_vm12 = vmor %vm2457_vm11, %vm2458_vm10 }
 0xcd0   : > { %v2453_v15 = vmul.f32 %v3884_v10, %v2452_v11 }
 0xcd2   : > { %v2454_v16 = vmul.f32 0.5, %v2453_v15 }
 0xcd4   : > { %v2455_v20 = vsub.f32 1.5, %v2454_v16 }
 0xcd6   : > { %v2456_v4 = vmul.f32 %v3884_v10, %v2455_v20 }
 0xcd8   : > { %v2460_v23 = vsel %vm2459_vm12, %v3884_v10, %v2456_v4 }
 0xcd9   : > { %v2461_v24 = vmul.f32 %v2460_v23, %v5074_v19 }
 0xcdb   : > { %v2465_v26 = vmul.f32 %v3842_v21, %v2461_v24 }
 0xcdd   : > { %v2469_v27 = vadd.f32 %v3843_v25, %v2465_v26 }
 0xcdf   : > { %v2470_v28 = vpack.c.bf16 %v2469_v27, %v2469_v27 }
 0xce1   : > { %2581 = vmatmul.bf16.vlgmr.msra.gmra.mxu2 %v2470_v28  ;;  %2594 = vmatmul.bf16.vlgmr.msrb.gmra.mxu3 %v2470_v28 }
 0xd64   : > { %v2582_v35 = vpop.f32.mrf.mxu2  ;;  %v2595_v19 = vpop.f32.mrf.mxu3 }
 0xd65   : > { %v2583_v36 = vadd.f32 %v2582_v35, %v2489_v33  ;;  %v2596_v22 = vadd.f32 %v2595_v19, %v2490_v34 }
 0xd67   : > { %v2599_v37 = vmax.f32 %v2583_v36, 0.0  ;;  %v2600_v39 = vmax.f32 %v2596_v22, 0.0 }
 0xd69   : > { %v2601_v40 = vpack.c.bf16 %v2599_v37, %v2599_v37  ;;  %v2602_v41 = vpack.c.bf16 %v2600_v39, %v2600_v39 }
 0xd6b   : > { %2743 = vmatmul.bf16.vlgmr.msra.gmra.mxu0 %v2601_v40  ;;  %2756 = vmatmul.bf16.vlgmr.msrb.gmra.mxu1 %v2602_v41 }
 0xd6c   : > { %v2584_v42 = vpop.f32.mrf.mxu2  ;;  %v2597_v43 = vpop.f32.mrf.mxu3 }
 0xde8   : > { %v2744_v45 = vpop.f32.mrf.mxu0  ;;  %v2757_v46 = vpop.f32.mrf.mxu1 }
 0xde9   : > { %v2745_v47 = vadd.f32 %v3844_v44, %v2744_v45 }
 0xdeb   : > { %v2758_v49 = vadd.f32 %v2757_v46, %v2745_v47 }
 0xded   : > { %v2761_v50 = vadd.f32 %v2758_v49, %v2469_v27 }
 0xdef   : > { %2764 = vadd.xlane.f32.xlu2 %v2761_v50 }
 0xdf0   : > { %v2746_v51 = vpop.f32.mrf.mxu0  ;;  %v2759_v52 = vpop.f32.mrf.mxu1 }
 0xe62   : > { %v2765_v53 = vpop.xlane.xlu2 %2764 }
 0xe63   : > { %v2766_v54 = vmul.f32 %v2765_v53, %v5007_v38 }
 0xe65   : > { %v2767_v55 = vsub.f32 %v2761_v50, %v2766_v54 }
 0xe67   : > { %v2768_v56 = vmul.f32 %v2767_v55, %v2767_v55 }
 0xe69   : > { %2769 = vadd.xlane.f32.xlu0 %v2768_v56 }
 0xedc   : > { %v2770_v57 = vpop.xlane.xlu0 %2769 }
 0xedd   : > { %v2771_v58 = vmul.f32 %v2770_v57, %v5007_v38 }
 0xedf   : > { %v2772_v59 = vadd.f32 1e-05, %v2771_v58 }
 0xee1   : > { %3885 = vrsqrt.f32 %v2772_v59  ;;  %vm2779_vm14 = vweird.f32 %v2772_v59 }
 0xee7   : > { %v3886_v48 = vpop.eup %3885 }
 0xee8   : > { %v2774_v60 = vmul.f32 %v3886_v48, %v2772_v59  ;;  %vm2780_vm13 = vweird.f32 %v3886_v48 }
 0xee9   : > { %vm2781_vm15 = vmor %vm2779_vm14, %vm2780_vm13 }
 0xeea   : > { %v2775_v61 = vmul.f32 %v3886_v48, %v2774_v60 }
 0xeec   : > { %v2776_v62 = vmul.f32 0.5, %v2775_v61 }
 0xeee   : > { %v2777_v63 = vsub.f32 1.5, %v2776_v62 }
 0xef0   : > { %v2778_v0 = vmul.f32 %v3886_v48, %v2777_v63 }
 0xef2   : > { %v2782_v2 = vsel %vm2781_vm15, %v3886_v48, %v2778_v0 }
 0xef3   : > { %v2783_v38 = vmul.f32 %v2782_v2, %v2767_v55 }
 0xef5   : > { %v2787_v5 = vmul.f32 %v3845_v1, %v2783_v38 }
 0xef7   : > { %v2791_v6 = vadd.f32 %v3846_v3, %v2787_v5 }
 0xef9   : > { %2792 = vst [vmem:[%s1223_s12] sm:$0xff] %v2791_v6 }
 0xefa   : > { %4334 = shalt.err (!%p4331_p12)
}
 0xefb   : > { %3658 = dma.vmem_to_hbm [thread:$0]  (%p4773_p6), %s2808_s18, 128, %s2810_s10, %s2794_s20  }
 0xefc PF: > { %s2821_s29 = sand.u32 1, %s4397_s15   ;;  %p5227_p4 = scmp.ne.s32.totalorder %s5188_s3, 0 }
 0xefd   : > { %p5228_p8 = scmp.ge.s32.totalorder %s4417_s23, 2  ;;  %s2822_s2 = scalar_lea.sflag [#allocation4], %s2821_s29 }
 0xeff   : > { %p3705_p7 = pnand %p5228_p8, %p5227_p4 }
 0xf01   : > { %p3706_p9 = pneg %p3705_p7 }
 0xf03   : > { %4392 = dma.done.wait (%p3706_p9), %s2822_s2, 128  }
 0xf04   : > { %4394 = vsyncadd (%p3706_p9), %s2822_s2, 4294967168  ;;  %s86_s23 = sadd.s32 1, %s4417_s23   ;;  %s5229_s19 = sld [smem:[#allocation61_spill]] }
 0xf05   : > { %p83_p11 = scmp.ge.s32.totalorder %s86_s23, 4   ;;  %s5230_s18 = sld [smem:[#allocation65_spill]] }
 0xf06   : > { %s5231_s13 = sld [smem:[#allocation64_spill]]  ;;  %s5232_s15 = smov %s4401_s16 }
 0xf07   : > { %s5234_s0 = smov %s4413_s22 }
 0xf08   :  { %85 = sbr.rel (!%p83_p11) target bundleno = 76 (0x4c), region = 287 }
 0xf0a   : > { %s5233_s16 = smov %s5229_s19 }
 0xf0c   : > { %s5235_s22 = smov %s5231_s13 }
 0xf0d   :  { %2828 = vsyncpa [#allocation3], 1 }
 0xf0e   :  { %2830 = vsyncpa [#allocation3 + $0x1], 1 }
 0xf0f   :  { %2831 = vsyncpa [#allocation6], 1 }
 0xf10   :  { %2833 = vsyncpa [#allocation6 + $0x1], 1 }
 0xf11   :  { %2834 = vsyncpa [#allocation9], 1 }
 0xf12   :  { %2835 = vsyncpa [#allocation12], 1 }
 0xf13   :  { %2836 = vsyncpa [#allocation15], 1 }
 0xf14   :  { %2837 = vsyncpa [#allocation18], 1 }
 0xf15   :  { %2838 = vsyncpa [#allocation21], 1 }
 0xf16   :  { %2839 = vsyncpa [#allocation24], 1 }
 0xf17   :  { %2840 = vsyncpa [#allocation4], 1 }
 0xf18   :  { %2842 = vsyncpa [#allocation4 + $0x1], 1 }

</bundles_post_ra>
